<compile_context>
chip_gen: v6e
topology: v6e:2x2x1
jax: 0.10.0
libtpu: 0.0.40
codegen_flags: <defaults>
</compile_context>

<pallas_src>
import math
import functools

import jax
import jax.numpy as jnp
from jax.experimental import pallas as pl
from jax.experimental.pallas import tpu as pltpu  # noqa: F401  (TPU backend)


# ----------------------------- in-kernel helpers -----------------------------

def _layernorm(y, g, b):
    # PyTorch LayerNorm: biased variance, eps=1e-5.
    mean = jnp.mean(y, axis=-1, keepdims=True)
    var = jnp.mean((y - mean) ** 2, axis=-1, keepdims=True)
    return (y - mean) * jax.lax.rsqrt(var + 1e-5) * g + b


# ----------------------------- Pallas kernels -----------------------------

def _input_embed_kernel(x_ref, wt_ref, b_ref, pe_ref, o_ref):
    # input_linear fused with positional-encoding add:  o = x @ Wt + b + pe
    o_ref[...] = (jnp.dot(x_ref[...], wt_ref[...],
                          preferred_element_type=jnp.float32)
                  + b_ref[...] + pe_ref[...])


def _qkv_kernel(x_ref, wt_ref, b_ref, o_ref):
    # fused QKV projection: (M, E) @ (E, 3E) + (1, 3E)
    o_ref[...] = jnp.dot(x_ref[...], wt_ref[...],
                         preferred_element_type=jnp.float32) + b_ref[...]


def _cross_qkv_kernel(x_ref, mem_ref, wq_ref, bq_ref, wkv_ref, bkv_ref,
                      q_ref, kv_ref):
    # cross-attention projections in one launch: q from tgt, fused kv from memory.
    q_ref[...] = jnp.dot(x_ref[...], wq_ref[...],
                         preferred_element_type=jnp.float32) + bq_ref[...]
    kv_ref[...] = jnp.dot(mem_ref[...], wkv_ref[...],
                          preferred_element_type=jnp.float32) + bkv_ref[...]


def _mha_kernel(q_ref, k_ref, v_ref, o_ref):
    # All (batch*head) slices in ONE kernel via batched einsum (no grid).
    # q: (BH, T, dh), k/v: (BH, S, dh).  f32 softmax, approx-reciprocal on EUP.
    scale = 1.0 / math.sqrt(q_ref.shape[-1])
    q = q_ref[...]
    k = k_ref[...]
    v = v_ref[...]
    s = jnp.einsum("bqd,bkd->bqk", q, k,
                   preferred_element_type=jnp.float32) * scale
    s = s - jnp.max(s, axis=-1, keepdims=True)
    p = jnp.exp(s)
    denom = jnp.sum(p, axis=-1, keepdims=True)
    p = p * pl.reciprocal(denom, approx=True)
    o_ref[...] = jnp.einsum("bqk,bkd->bqd", p, v,
                            preferred_element_type=jnp.float32)


def _proj_res_ln_kernel(a_ref, wt_ref, b_ref, res_ref, g_ref, beta_ref, o_ref):
    # out_proj + residual add + LayerNorm, fused.
    y = (jnp.dot(a_ref[...], wt_ref[...], preferred_element_type=jnp.float32)
         + b_ref[...] + res_ref[...])
    o_ref[...] = _layernorm(y, g_ref[...], beta_ref[...])


def _ffn_res_ln_kernel(x_ref, w1_ref, b1_ref, w2_ref, b2_ref,
                       g_ref, beta_ref, o_ref):
    # linear1 + ReLU + linear2 + residual + LayerNorm, fused (hidden stays in VMEM).
    h = jnp.maximum(
        jnp.dot(x_ref[...], w1_ref[...],
                preferred_element_type=jnp.float32) + b1_ref[...], 0.0)
    y = (jnp.dot(h, w2_ref[...], preferred_element_type=jnp.float32)
         + b2_ref[...] + x_ref[...])
    o_ref[...] = _layernorm(y, g_ref[...], beta_ref[...])


def _ln_kernel(x_ref, g_ref, b_ref, o_ref):
    # plain LayerNorm (encoder final norm) — no zeros-residual trick.
    o_ref[...] = _layernorm(x_ref[...], g_ref[...], b_ref[...])


def _ln_out_kernel(x_ref, g_ref, b_ref, wt_ref, bo_ref, o_ref):
    # decoder final LayerNorm fused with output_linear -> single (M, 1) store.
    y = _layernorm(x_ref[...], g_ref[...], b_ref[...])
    o_ref[...] = jnp.dot(y, wt_ref[...],
                         preferred_element_type=jnp.float32) + bo_ref[...]


# ----------------------------- call helpers -----------------------------

def _pcall(kernel, out_shape, *args):
    # Whole arrays fit VMEM at these shapes -> single-block call, no grid/BlockSpecs.
    return pl.pallas_call(kernel, out_shape=out_shape)(*args)


def _f32(shape):
    return jax.ShapeDtypeStruct(shape, jnp.float32)


# ----------------------------- head plumbing (tiny XLA reshapes) ------------

def split_heads(x_flat, L, N, H):
    # (L*N, E) -> (N*H, L, dh); matches torch reshape(L, N*H, dh).transpose(0, 1).
    E = x_flat.shape[-1]
    dh = E // H
    return x_flat.reshape(L, N * H, dh).transpose(1, 0, 2)


def merge_heads(o, L, N, H):
    # (N*H, L, dh) -> (L*N, E); matches torch transpose(0, 1).reshape(L*N, E).
    dh = o.shape[-1]
    return o.transpose(1, 0, 2).reshape(L * N, H * dh)


# ----------------------------- model pieces -----------------------------

def make_positional_encoding(seq_len, d_model):
    position = jnp.arange(seq_len, dtype=jnp.float32)[:, None]
    div_term = jnp.exp(jnp.arange(0, d_model, 2, dtype=jnp.float32)
                       * (-math.log(10000.0) / d_model))
    angles = position * div_term                       # (S, d_model//2)
    pe = jnp.zeros((seq_len, d_model), jnp.float32)
    pe = pe.at[:, 0::2].set(jnp.sin(angles))
    pe = pe.at[:, 1::2].set(jnp.cos(angles))
    return pe                                          # (S, d_model)


def self_attention_sublayer(x, in_wt, in_b, out_wt, out_b, norm_w, norm_b, L, N, H):
    """x: (L*N, E).  Returns LayerNorm(x + out_proj(MHA(x, x, x)))."""
    E = x.shape[-1]
    M = L * N
    qkv = _pcall(_qkv_kernel, _f32((M, 3 * E)), x, in_wt, in_b)
    q = split_heads(qkv[:, :E], L, N, H)
    k = split_heads(qkv[:, E:2 * E], L, N, H)
    v = split_heads(qkv[:, 2 * E:], L, N, H)
    o = _pcall(_mha_kernel, _f32(q.shape), q, k, v)
    o = merge_heads(o, L, N, H)
    return _pcall(_proj_res_ln_kernel, _f32((M, E)),
                  o, out_wt, out_b, x, norm_w, norm_b)


def cross_attention_sublayer(x, mem, p, T, S, N, H):
    """x: (T*N, E), mem: (S*N, E).  Returns LayerNorm(x + out_proj(MHA(x, mem, mem)))."""
    E = x.shape[-1]
    M = T * N
    q_proj, kv_proj = _pcall(
        _cross_qkv_kernel,
        (_f32((M, E)), _f32((S * N, 2 * E))),
        x, mem, p["ca_q_wt"], p["ca_q_b"], p["ca_kv_wt"], p["ca_kv_b"])
    q = split_heads(q_proj, T, N, H)
    k = split_heads(kv_proj[:, :E], S, N, H)
    v = split_heads(kv_proj[:, E:], S, N, H)
    o = _pcall(_mha_kernel, _f32(q.shape), q, k, v)
    o = merge_heads(o, T, N, H)
    return _pcall(_proj_res_ln_kernel, _f32((M, E)),
                  o, p["ca_out_wt"], p["ca_out_b"], x, p["norm2_w"], p["norm2_b"])


def ffn_sublayer(x, w1t, b1, w2t, b2, norm_w, norm_b):
    M, E = x.shape
    return _pcall(_ffn_res_ln_kernel, _f32((M, E)),
                  x, w1t, b1, w2t, b2, norm_w, norm_b)


def encoder_layer(x, p, L, N, H):
    x = self_attention_sublayer(x, p["sa_in_wt"], p["sa_in_b"],
                                p["sa_out_wt"], p["sa_out_b"],
                                p["norm1_w"], p["norm1_b"], L, N, H)
    x = ffn_sublayer(x, p["lin1_wt"], p["lin1_b"], p["lin2_wt"], p["lin2_b"],
                     p["norm2_w"], p["norm2_b"])
    return x


def decoder_layer(x, mem, p, T, S, N, H):
    x = self_attention_sublayer(x, p["sa_in_wt"], p["sa_in_b"],
                                p["sa_out_wt"], p["sa_out_b"],
                                p["norm1_w"], p["norm1_b"], T, N, H)
    x = cross_attention_sublayer(x, mem, p, T, S, N, H)
    x = ffn_sublayer(x, p["lin1_wt"], p["lin1_b"], p["lin2_wt"], p["lin2_b"],
                     p["norm3_w"], p["norm3_b"])
    return x


def time_series_transformer_forward(src, params, num_heads):
    # src: (S, N, input_dim)
    S, N, input_dim = src.shape
    E = params["input_wt"].shape[1]
    M = S * N

    # PE is a compile-time constant; broadcast over batch once (tiny).
    pe_flat = jnp.broadcast_to(make_positional_encoding(S, E)[:, None, :],
                               (S, N, E)).reshape(M, E)

    x = _pcall(_input_embed_kernel, _f32((M, E)),
               src.reshape(M, input_dim), params["input_wt"], params["input_b"],
               pe_flat)
    # TODO(synk): nn.Dropout(p=0.1) is stochastic only in train mode; inference -> identity.

    mem = x
    for lp in params["encoder_layers"]:
        mem = encoder_layer(mem, lp, S, N, num_heads)
    mem = _pcall(_ln_kernel, _f32((M, E)),
                 mem, params["enc_norm_w"], params["enc_norm_b"])

    out = x  # transformer(src, src): tgt == positionally-encoded src
    for lp in params["decoder_layers"]:
        out = decoder_layer(out, mem, lp, S, S, N, num_heads)

    y = _pcall(_ln_out_kernel, _f32((M, 1)),
               out, params["dec_norm_w"], params["dec_norm_b"],
               params["output_wt"], params["output_b"])
    return y.reshape(S, N, 1)


# ----------------------------- parameter init -----------------------------

class _KeyGen:
    def __init__(self, key):
        self.key = key

    def __call__(self):
        self.key, sub = jax.random.split(self.key)
        return sub


def init_params(key, input_dim, model_dim, num_heads, num_enc, num_dec, dim_ff):
    """Weights stored pre-transposed (in_features, out_features); biases (1, out)."""
    kg = _KeyGen(key)
    E = model_dim
    normal = lambda shape: 0.02 * jax.random.normal(kg(), shape, jnp.float32)
    zeros = lambda *shape: jnp.zeros(shape, jnp.float32)
    ones = lambda *shape: jnp.ones(shape, jnp.float32)

    def enc_layer_params():
        return {
            "sa_in_wt": normal((E, 3 * E)), "sa_in_b": zeros(1, 3 * E),
            "sa_out_wt": normal((E, E)), "sa_out_b": zeros(1, E),
            "lin1_wt": normal((E, dim_ff)), "lin1_b": zeros(1, dim_ff),
            "lin2_wt": normal((dim_ff, E)), "lin2_b": zeros(1, E),
            "norm1_w": ones(1, E), "norm1_b": zeros(1, E),
            "norm2_w": ones(1, E), "norm2_b": zeros(1, E),
        }

    def dec_layer_params():
        p = enc_layer_params()
        p.update({
            "ca_q_wt": normal((E, E)), "ca_q_b": zeros(1, E),
            "ca_kv_wt": normal((E, 2 * E)), "ca_kv_b": zeros(1, 2 * E),
            "ca_out_wt": normal((E, E)), "ca_out_b": zeros(1, E),
            "norm3_w": ones(1, E), "norm3_b": zeros(1, E),
        })
        return p

    return {
        "input_wt": normal((input_dim, E)), "input_b": zeros(1, E),
        "output_wt": normal((E, 1)), "output_b": zeros(1, 1),
        "encoder_layers": [enc_layer_params() for _ in range(num_enc)],
        "decoder_layers": [dec_layer_params() for _ in range(num_dec)],
        "enc_norm_w": ones(1, E), "enc_norm_b": zeros(1, E),
        "dec_norm_w": ones(1, E), "dec_norm_b": zeros(1, E),
    }


# ----------------------------- main -----------------------------

if __name__ == "__main__":
    # Small shapes consistent with the module: seq=8, batch=2, input_dim=4,
    # model_dim=32, heads=4, 2 encoder + 2 decoder layers, dim_feedforward=2048 (torch default).
    S, N, INPUT_DIM = 8, 2, 4
    MODEL_DIM, NUM_HEADS = 32, 4
    NUM_ENC, NUM_DEC, DIM_FF = 2, 2, 2048

    root = jax.random.PRNGKey(0)
    k_param, k_src = jax.random.split(root)
    params = init_params(k_param, INPUT_DIM, MODEL_DIM, NUM_HEADS, NUM_ENC, NUM_DEC, DIM_FF)
    src = jax.random.normal(k_src, (S, N, INPUT_DIM), jnp.float32)

    fwd = jax.jit(functools.partial(time_series_transformer_forward, num_heads=NUM_HEADS))
    out = fwd(src, params)
    out = jax.block_until_ready(out)

    assert out.shape == (S, N, 1), out.shape
    assert jnp.all(jnp.isfinite(out))
    print("KERNEL_OK")
</pallas_src>

<mosaic_0001>
module attributes {stable_mosaic.version = 11 : i64} {
  func.func @_qkv_kernel(%arg0: memref<16x32xf32, #tpu.memory_space<vmem>>, %arg1: memref<32x96xf32, #tpu.memory_space<vmem>>, %arg2: memref<1x96xf32, #tpu.memory_space<vmem>>, %arg3: memref<16x96xf32, #tpu.memory_space<vmem>>) attributes {dimension_semantics = [], scalar_prefetch = 0 : i64, scratch_operands = 0 : i64, tpu.core_type = #tpu.core_type<tc>} {
    %c0 = arith.constant 0 : index
    %c0_0 = arith.constant 0 : index
    %0 = vector.load %arg0[%c0, %c0_0] : memref<16x32xf32, #tpu.memory_space<vmem>>, vector<16x32xf32>
    %c0_1 = arith.constant 0 : index
    %c0_2 = arith.constant 0 : index
    %1 = vector.load %arg1[%c0_1, %c0_2] : memref<32x96xf32, #tpu.memory_space<vmem>>, vector<32x96xf32>
    %cst = arith.constant dense<0.000000e+00> : vector<16x96xf32>
    %2 = tpu.matmul %0, %1, %cst {dimension_numbers = #tpu.dot_dimension_numbers<[1], [0], [0], [1], [0, 0, 1, 1], [], []>} : vector<16x32xf32>, vector<32x96xf32>, vector<16x96xf32> -> vector<16x96xf32>
    %c0_3 = arith.constant 0 : index
    %c0_4 = arith.constant 0 : index
    %3 = vector.load %arg2[%c0_3, %c0_4] : memref<1x96xf32, #tpu.memory_space<vmem>>, vector<1x96xf32>
    %4 = vector.broadcast %3 : vector<1x96xf32> to vector<16x96xf32>
    %5 = arith.addf %2, %4 : vector<16x96xf32>
    %c0_5 = arith.constant 0 : index
    %c0_6 = arith.constant 0 : index
    %6 = vector.load %arg3[%c0_5, %c0_6] : memref<16x96xf32, #tpu.memory_space<vmem>>, vector<16x96xf32>
    tpu.vector_store %arg3[%c0_5, %c0_6], %5 {strides = array<i32>} : memref<16x96xf32, #tpu.memory_space<vmem>>, vector<16x96xf32>,
    return
  }
}

module attributes {stable_mosaic.version = 11 : i64} {
  func.func @_input_embed_kernel(%arg0: memref<16x4xf32, #tpu.memory_space<vmem>>, %arg1: memref<4x32xf32, #tpu.memory_space<vmem>>, %arg2: memref<1x32xf32, #tpu.memory_space<vmem>>, %arg3: memref<16x32xf32, #tpu.memory_space<vmem>>, %arg4: memref<16x32xf32, #tpu.memory_space<vmem>>) attributes {dimension_semantics = [], scalar_prefetch = 0 : i64, scratch_operands = 0 : i64, tpu.core_type = #tpu.core_type<tc>} {
    %c0 = arith.constant 0 : index
    %c0_0 = arith.constant 0 : index
    %0 = vector.load %arg0[%c0, %c0_0] : memref<16x4xf32, #tpu.memory_space<vmem>>, vector<16x4xf32>
    %c0_1 = arith.constant 0 : index
    %c0_2 = arith.constant 0 : index
    %1 = vector.load %arg1[%c0_1, %c0_2] : memref<4x32xf32, #tpu.memory_space<vmem>>, vector<4x32xf32>
    %cst = arith.constant dense<0.000000e+00> : vector<16x32xf32>
    %2 = tpu.matmul %0, %1, %cst {dimension_numbers = #tpu.dot_dimension_numbers<[1], [0], [0], [1], [0, 0, 1, 1], [], []>} : vector<16x4xf32>, vector<4x32xf32>, vector<16x32xf32> -> vector<16x32xf32>
    %c0_3 = arith.constant 0 : index
    %c0_4 = arith.constant 0 : index
    %3 = vector.load %arg2[%c0_3, %c0_4] : memref<1x32xf32, #tpu.memory_space<vmem>>, vector<1x32xf32>
    %4 = vector.broadcast %3 : vector<1x32xf32> to vector<16x32xf32>
    %5 = arith.addf %2, %4 : vector<16x32xf32>
    %c0_5 = arith.constant 0 : index
    %c0_6 = arith.constant 0 : index
    %6 = vector.load %arg3[%c0_5, %c0_6] : memref<16x32xf32, #tpu.memory_space<vmem>>, vector<16x32xf32>
    %7 = arith.addf %5, %6 : vector<16x32xf32>
    %c0_7 = arith.constant 0 : index
    %c0_8 = arith.constant 0 : index
    %8 = vector.load %arg4[%c0_7, %c0_8] : memref<16x32xf32, #tpu.memory_space<vmem>>, vector<16x32xf32>
    tpu.vector_store %arg4[%c0_7, %c0_8], %7 {strides = array<i32>} : memref<16x32xf32, #tpu.memory_space<vmem>>, vector<16x32xf32>,
    return
  }
}

module attributes {stable_mosaic.version = 11 : i64} {
  func.func @_mha_kernel(%arg0: memref<8x8x8xf32, #tpu.memory_space<vmem>>, %arg1: memref<8x8x8xf32, #tpu.memory_space<vmem>>, %arg2: memref<8x8x8xf32, #tpu.memory_space<vmem>>, %arg3: memref<8x8x8xf32, #tpu.memory_space<vmem>>) attributes {dimension_semantics = [], scalar_prefetch = 0 : i64, scratch_operands = 0 : i64, tpu.core_type = #tpu.core_type<tc>} {
    %c0 = arith.constant 0 : index
    %c0_0 = arith.constant 0 : index
    %c0_1 = arith.constant 0 : index
    %0 = vector.load %arg0[%c0, %c0_0, %c0_1] : memref<8x8x8xf32, #tpu.memory_space<vmem>>, vector<8x8x8xf32>
    %c0_2 = arith.constant 0 : index
    %c0_3 = arith.constant 0 : index
    %c0_4 = arith.constant 0 : index
    %1 = vector.load %arg1[%c0_2, %c0_3, %c0_4] : memref<8x8x8xf32, #tpu.memory_space<vmem>>, vector<8x8x8xf32>
    %c0_5 = arith.constant 0 : index
    %c0_6 = arith.constant 0 : index
    %c0_7 = arith.constant 0 : index
    %2 = vector.load %arg2[%c0_5, %c0_6, %c0_7] : memref<8x8x8xf32, #tpu.memory_space<vmem>>, vector<8x8x8xf32>
    "tpu.trace_start"() <{level = 10 : i32, message = "bqd,bkd->bqk"}> : () -> ()
    %cst = arith.constant dense<0.000000e+00> : vector<8x8x8xf32>
    %3 = tpu.matmul %0, %1, %cst {dimension_numbers = #tpu.dot_dimension_numbers<[2], [2], [1], [1], [0, 0, 0, 1, 1, 1], [0], [0]>} : vector<8x8x8xf32>, vector<8x8x8xf32>, vector<8x8x8xf32> -> vector<8x8x8xf32>
    "tpu.trace_stop"() : () -> ()
    %cst_8 = arith.constant 0.353553385 : f32
    %4 = vector.broadcast %cst_8 : f32 to vector<8x8x8xf32>
    %5 = arith.mulf %3, %4 : vector<8x8x8xf32>
    %cst_9 = arith.constant dense<0xFF800000> : vector<8x8xf32>
    %6 = vector.multi_reduction <maximumf>, %5, %cst_9 [2] : vector<8x8x8xf32> to vector<8x8xf32>
    %7 = vector.shape_cast %6 : vector<8x8xf32> to vector<8x8x1xf32>
    %8 = vector.broadcast %7 : vector<8x8x1xf32> to vector<8x8x8xf32>
    %9 = arith.subf %5, %8 : vector<8x8x8xf32>
    %10 = math.exp %9 : vector<8x8x8xf32>
    %cst_10 = arith.constant dense<0.000000e+00> : vector<8x8xf32>
    %11 = vector.multi_reduction <add>, %10, %cst_10 [2] : vector<8x8x8xf32> to vector<8x8xf32>
    %12 = vector.shape_cast %11 : vector<8x8xf32> to vector<8x8x1xf32>
    %13 = tpu.reciprocal %12 {approx = true} : vector<8x8x1xf32> -> vector<8x8x1xf32>
    %14 = vector.broadcast %13 : vector<8x8x1xf32> to vector<8x8x8xf32>
    %15 = arith.mulf %10, %14 : vector<8x8x8xf32>
    "tpu.trace_start"() <{level = 10 : i32, message = "bqk,bkd->bqd"}> : () -> ()
    %cst_11 = arith.constant dense<0.000000e+00> : vector<8x8x8xf32>
    %16 = tpu.matmul %15, %2, %cst_11 {dimension_numbers = #tpu.dot_dimension_numbers<[2], [1], [1], [2], [0, 0, 0, 1, 1, 2], [0], [0]>} : vector<8x8x8xf32>, vector<8x8x8xf32>, vector<8x8x8xf32> -> vector<8x8x8xf32>
    "tpu.trace_stop"() : () -> ()
    %c0_12 = arith.constant 0 : index
    %c0_13 = arith.constant 0 : index
    %c0_14 = arith.constant 0 : index
    %17 = vector.load %arg3[%c0_12, %c0_13, %c0_14] : memref<8x8x8xf32, #tpu.memory_space<vmem>>, vector<8x8x8xf32>
    tpu.vector_store %arg3[%c0_12, %c0_13, %c0_14], %16 {strides = array<i32>} : memref<8x8x8xf32, #tpu.memory_space<vmem>>, vector<8x8x8xf32>,
    return
  }
}

module attributes {stable_mosaic.version = 11 : i64} {
  func.func @_proj_res_ln_kernel(%arg0: memref<16x32xf32, #tpu.memory_space<vmem>>, %arg1: memref<32x32xf32, #tpu.memory_space<vmem>>, %arg2: memref<1x32xf32, #tpu.memory_space<vmem>>, %arg3: memref<16x32xf32, #tpu.memory_space<vmem>>, %arg4: memref<1x32xf32, #tpu.memory_space<vmem>>, %arg5: memref<1x32xf32, #tpu.memory_space<vmem>>, %arg6: memref<16x32xf32, #tpu.memory_space<vmem>>) attributes {dimension_semantics = [], scalar_prefetch = 0 : i64, scratch_operands = 0 : i64, tpu.core_type = #tpu.core_type<tc>} {
    %c0 = arith.constant 0 : index
    %c0_0 = arith.constant 0 : index
    %0 = vector.load %arg0[%c0, %c0_0] : memref<16x32xf32, #tpu.memory_space<vmem>>, vector<16x32xf32>
    %c0_1 = arith.constant 0 : index
    %c0_2 = arith.constant 0 : index
    %1 = vector.load %arg1[%c0_1, %c0_2] : memref<32x32xf32, #tpu.memory_space<vmem>>, vector<32x32xf32>
    %cst = arith.constant dense<0.000000e+00> : vector<16x32xf32>
    %2 = tpu.matmul %0, %1, %cst {dimension_numbers = #tpu.dot_dimension_numbers<[1], [0], [0], [1], [0, 0, 1, 1], [], []>} : vector<16x32xf32>, vector<32x32xf32>, vector<16x32xf32> -> vector<16x32xf32>
    %c0_3 = arith.constant 0 : index
    %c0_4 = arith.constant 0 : index
    %3 = vector.load %arg2[%c0_3, %c0_4] : memref<1x32xf32, #tpu.memory_space<vmem>>, vector<1x32xf32>
    %4 = vector.broadcast %3 : vector<1x32xf32> to vector<16x32xf32>
    %5 = arith.addf %2, %4 : vector<16x32xf32>
    %c0_5 = arith.constant 0 : index
    %c0_6 = arith.constant 0 : index
    %6 = vector.load %arg3[%c0_5, %c0_6] : memref<16x32xf32, #tpu.memory_space<vmem>>, vector<16x32xf32>
    %7 = arith.addf %5, %6 : vector<16x32xf32>
    %c0_7 = arith.constant 0 : index
    %c0_8 = arith.constant 0 : index
    %8 = vector.load %arg4[%c0_7, %c0_8] : memref<1x32xf32, #tpu.memory_space<vmem>>, vector<1x32xf32>
    %c0_9 = arith.constant 0 : index
    %c0_10 = arith.constant 0 : index
    %9 = vector.load %arg5[%c0_9, %c0_10] : memref<1x32xf32, #tpu.memory_space<vmem>>, vector<1x32xf32>
    %cst_11 = arith.constant dense<0.000000e+00> : vector<16xf32>
    %10 = vector.multi_reduction <add>, %7, %cst_11 [1] : vector<16x32xf32> to vector<16xf32>
    %11 = vector.shape_cast %10 : vector<16xf32> to vector<16x1xf32>
    %cst_12 = arith.constant 3.200000e+01 : f32
    %12 = vector.broadcast %cst_12 : f32 to vector<16x1xf32>
    %13 = arith.divf %11, %12 : vector<16x1xf32>
    %14 = vector.broadcast %13 : vector<16x1xf32> to vector<16x32xf32>
    %15 = arith.subf %7, %14 : vector<16x32xf32>
    %16 = arith.mulf %15, %15 : vector<16x32xf32>
    %cst_13 = arith.constant dense<0.000000e+00> : vector<16xf32>
    %17 = vector.multi_reduction <add>, %16, %cst_13 [1] : vector<16x32xf32> to vector<16xf32>
    %18 = vector.shape_cast %17 : vector<16xf32> to vector<16x1xf32>
    %cst_14 = arith.constant 3.200000e+01 : f32
    %19 = vector.broadcast %cst_14 : f32 to vector<16x1xf32>
    %20 = arith.divf %18, %19 : vector<16x1xf32>
    %21 = vector.broadcast %13 : vector<16x1xf32> to vector<16x32xf32>
    %22 = arith.subf %7, %21 : vector<16x32xf32>
    %cst_15 = arith.constant 9.99999974E-6 : f32
    %23 = vector.broadcast %cst_15 : f32 to vector<16x1xf32>
    %24 = arith.addf %20, %23 : vector<16x1xf32>
    %25 = math.rsqrt %24 : vector<16x1xf32>
    %26 = vector.broadcast %25 : vector<16x1xf32> to vector<16x32xf32>
    %27 = arith.mulf %22, %26 : vector<16x32xf32>
    %28 = vector.broadcast %8 : vector<1x32xf32> to vector<16x32xf32>
    %29 = arith.mulf %27, %28 : vector<16x32xf32>
    %30 = vector.broadcast %9 : vector<1x32xf32> to vector<16x32xf32>
    %31 = arith.addf %29, %30 : vector<16x32xf32>
    %c0_16 = arith.constant 0 : index
    %c0_17 = arith.constant 0 : index
    %32 = vector.load %arg6[%c0_16, %c0_17] : memref<16x32xf32, #tpu.memory_space<vmem>>, vector<16x32xf32>
    tpu.vector_store %arg6[%c0_16, %c0_17], %31 {strides = array<i32>} : memref<16x32xf32, #tpu.memory_space<vmem>>, vector<16x32xf32>,
    return
  }
}

module attributes {stable_mosaic.version = 11 : i64} {
  func.func @_ffn_res_ln_kernel(%arg0: memref<16x32xf32, #tpu.memory_space<vmem>>, %arg1: memref<32x2048xf32, #tpu.memory_space<vmem>>, %arg2: memref<1x2048xf32, #tpu.memory_space<vmem>>, %arg3: memref<2048x32xf32, #tpu.memory_space<vmem>>, %arg4: memref<1x32xf32, #tpu.memory_space<vmem>>, %arg5: memref<1x32xf32, #tpu.memory_space<vmem>>, %arg6: memref<1x32xf32, #tpu.memory_space<vmem>>, %arg7: memref<16x32xf32, #tpu.memory_space<vmem>>) attributes {dimension_semantics = [], scalar_prefetch = 0 : i64, scratch_operands = 0 : i64, tpu.core_type = #tpu.core_type<tc>} {
    %c0 = arith.constant 0 : index
    %c0_0 = arith.constant 0 : index
    %0 = vector.load %arg0[%c0, %c0_0] : memref<16x32xf32, #tpu.memory_space<vmem>>, vector<16x32xf32>
    %c0_1 = arith.constant 0 : index
    %c0_2 = arith.constant 0 : index
    %1 = vector.load %arg1[%c0_1, %c0_2] : memref<32x2048xf32, #tpu.memory_space<vmem>>, vector<32x2048xf32>
    %cst = arith.constant dense<0.000000e+00> : vector<16x2048xf32>
    %2 = tpu.matmul %0, %1, %cst {dimension_numbers = #tpu.dot_dimension_numbers<[1], [0], [0], [1], [0, 0, 1, 1], [], []>} : vector<16x32xf32>, vector<32x2048xf32>, vector<16x2048xf32> -> vector<16x2048xf32>
    %c0_3 = arith.constant 0 : index
    %c0_4 = arith.constant 0 : index
    %3 = vector.load %arg2[%c0_3, %c0_4] : memref<1x2048xf32, #tpu.memory_space<vmem>>, vector<1x2048xf32>
    %4 = vector.broadcast %3 : vector<1x2048xf32> to vector<16x2048xf32>
    %5 = arith.addf %2, %4 : vector<16x2048xf32>
    %cst_5 = arith.constant 0.000000e+00 : f32
    %6 = vector.broadcast %cst_5 : f32 to vector<16x2048xf32>
    %7 = arith.maximumf %5, %6 : vector<16x2048xf32>
    %c0_6 = arith.constant 0 : index
    %c0_7 = arith.constant 0 : index
    %8 = vector.load %arg3[%c0_6, %c0_7] : memref<2048x32xf32, #tpu.memory_space<vmem>>, vector<2048x32xf32>
    %cst_8 = arith.constant dense<0.000000e+00> : vector<16x32xf32>
    %9 = tpu.matmul %7, %8, %cst_8 {dimension_numbers = #tpu.dot_dimension_numbers<[1], [0], [0], [1], [0, 0, 1, 1], [], []>} : vector<16x2048xf32>, vector<2048x32xf32>, vector<16x32xf32> -> vector<16x32xf32>
    %c0_9 = arith.constant 0 : index
    %c0_10 = arith.constant 0 : index
    %10 = vector.load %arg4[%c0_9, %c0_10] : memref<1x32xf32, #tpu.memory_space<vmem>>, vector<1x32xf32>
    %11 = vector.broadcast %10 : vector<1x32xf32> to vector<16x32xf32>
    %12 = arith.addf %9, %11 : vector<16x32xf32>
    %c0_11 = arith.constant 0 : index
    %c0_12 = arith.constant 0 : index
    %13 = vector.load %arg0[%c0_11, %c0_12] : memref<16x32xf32, #tpu.memory_space<vmem>>, vector<16x32xf32>
    %14 = arith.addf %12, %13 : vector<16x32xf32>
    %c0_13 = arith.constant 0 : index
    %c0_14 = arith.constant 0 : index
    %15 = vector.load %arg5[%c0_13, %c0_14] : memref<1x32xf32, #tpu.memory_space<vmem>>, vector<1x32xf32>
    %c0_15 = arith.constant 0 : index
    %c0_16 = arith.constant 0 : index
    %16 = vector.load %arg6[%c0_15, %c0_16] : memref<1x32xf32, #tpu.memory_space<vmem>>, vector<1x32xf32>
    %cst_17 = arith.constant dense<0.000000e+00> : vector<16xf32>
    %17 = vector.multi_reduction <add>, %14, %cst_17 [1] : vector<16x32xf32> to vector<16xf32>
    %18 = vector.shape_cast %17 : vector<16xf32> to vector<16x1xf32>
    %cst_18 = arith.constant 3.200000e+01 : f32
    %19 = vector.broadcast %cst_18 : f32 to vector<16x1xf32>
    %20 = arith.divf %18, %19 : vector<16x1xf32>
    %21 = vector.broadcast %20 : vector<16x1xf32> to vector<16x32xf32>
    %22 = arith.subf %14, %21 : vector<16x32xf32>
    %23 = arith.mulf %22, %22 : vector<16x32xf32>
    %cst_19 = arith.constant dense<0.000000e+00> : vector<16xf32>
    %24 = vector.multi_reduction <add>, %23, %cst_19 [1] : vector<16x32xf32> to vector<16xf32>
    %25 = vector.shape_cast %24 : vector<16xf32> to vector<16x1xf32>
    %cst_20 = arith.constant 3.200000e+01 : f32
    %26 = vector.broadcast %cst_20 : f32 to vector<16x1xf32>
    %27 = arith.divf %25, %26 : vector<16x1xf32>
    %28 = vector.broadcast %20 : vector<16x1xf32> to vector<16x32xf32>
    %29 = arith.subf %14, %28 : vector<16x32xf32>
    %cst_21 = arith.constant 9.99999974E-6 : f32
    %30 = vector.broadcast %cst_21 : f32 to vector<16x1xf32>
    %31 = arith.addf %27, %30 : vector<16x1xf32>
    %32 = math.rsqrt %31 : vector<16x1xf32>
    %33 = vector.broadcast %32 : vector<16x1xf32> to vector<16x32xf32>
    %34 = arith.mulf %29, %33 : vector<16x32xf32>
    %35 = vector.broadcast %15 : vector<1x32xf32> to vector<16x32xf32>
    %36 = arith.mulf %34, %35 : vector<16x32xf32>
    %37 = vector.broadcast %16 : vector<1x32xf32> to vector<16x32xf32>
    %38 = arith.addf %36, %37 : vector<16x32xf32>
    %c0_22 = arith.constant 0 : index
    %c0_23 = arith.constant 0 : index
    %39 = vector.load %arg7[%c0_22, %c0_23] : memref<16x32xf32, #tpu.memory_space<vmem>>, vector<16x32xf32>
    tpu.vector_store %arg7[%c0_22, %c0_23], %38 {strides = array<i32>} : memref<16x32xf32, #tpu.memory_space<vmem>>, vector<16x32xf32>,
    return
  }
}

module attributes {stable_mosaic.version = 11 : i64} {
  func.func @_cross_qkv_kernel(%arg0: memref<16x32xf32, #tpu.memory_space<vmem>>, %arg1: memref<16x32xf32, #tpu.memory_space<vmem>>, %arg2: memref<32x32xf32, #tpu.memory_space<vmem>>, %arg3: memref<1x32xf32, #tpu.memory_space<vmem>>, %arg4: memref<32x64xf32, #tpu.memory_space<vmem>>, %arg5: memref<1x64xf32, #tpu.memory_space<vmem>>, %arg6: memref<16x32xf32, #tpu.memory_space<vmem>>, %arg7: memref<16x64xf32, #tpu.memory_space<vmem>>) attributes {dimension_semantics = [], scalar_prefetch = 0 : i64, scratch_operands = 0 : i64, tpu.core_type = #tpu.core_type<tc>} {
    %c0 = arith.constant 0 : index
    %c0_0 = arith.constant 0 : index
    %0 = vector.load %arg0[%c0, %c0_0] : memref<16x32xf32, #tpu.memory_space<vmem>>, vector<16x32xf32>
    %c0_1 = arith.constant 0 : index
    %c0_2 = arith.constant 0 : index
    %1 = vector.load %arg2[%c0_1, %c0_2] : memref<32x32xf32, #tpu.memory_space<vmem>>, vector<32x32xf32>
    %cst = arith.constant dense<0.000000e+00> : vector<16x32xf32>
    %2 = tpu.matmul %0, %1, %cst {dimension_numbers = #tpu.dot_dimension_numbers<[1], [0], [0], [1], [0, 0, 1, 1], [], []>} : vector<16x32xf32>, vector<32x32xf32>, vector<16x32xf32> -> vector<16x32xf32>
    %c0_3 = arith.constant 0 : index
    %c0_4 = arith.constant 0 : index
    %3 = vector.load %arg3[%c0_3, %c0_4] : memref<1x32xf32, #tpu.memory_space<vmem>>, vector<1x32xf32>
    %4 = vector.broadcast %3 : vector<1x32xf32> to vector<16x32xf32>
    %5 = arith.addf %2, %4 : vector<16x32xf32>
    %c0_5 = arith.constant 0 : index
    %c0_6 = arith.constant 0 : index
    %6 = vector.load %arg6[%c0_5, %c0_6] : memref<16x32xf32, #tpu.memory_space<vmem>>, vector<16x32xf32>
    tpu.vector_store %arg6[%c0_5, %c0_6], %5 {strides = array<i32>} : memref<16x32xf32, #tpu.memory_space<vmem>>, vector<16x32xf32>,
    %c0_7 = arith.constant 0 : index
    %c0_8 = arith.constant 0 : index
    %7 = vector.load %arg1[%c0_7, %c0_8] : memref<16x32xf32, #tpu.memory_space<vmem>>, vector<16x32xf32>
    %c0_9 = arith.constant 0 : index
    %c0_10 = arith.constant 0 : index
    %8 = vector.load %arg4[%c0_9, %c0_10] : memref<32x64xf32, #tpu.memory_space<vmem>>, vector<32x64xf32>
    %cst_11 = arith.constant dense<0.000000e+00> : vector<16x64xf32>
    %9 = tpu.matmul %7, %8, %cst_11 {dimension_numbers = #tpu.dot_dimension_numbers<[1], [0], [0], [1], [0, 0, 1, 1], [], []>} : vector<16x32xf32>, vector<32x64xf32>, vector<16x64xf32> -> vector<16x64xf32>
    %c0_12 = arith.constant 0 : index
    %c0_13 = arith.constant 0 : index
    %10 = vector.load %arg5[%c0_12, %c0_13] : memref<1x64xf32, #tpu.memory_space<vmem>>, vector<1x64xf32>
    %11 = vector.broadcast %10 : vector<1x64xf32> to vector<16x64xf32>
    %12 = arith.addf %9, %11 : vector<16x64xf32>
    %c0_14 = arith.constant 0 : index
    %c0_15 = arith.constant 0 : index
    %13 = vector.load %arg7[%c0_14, %c0_15] : memref<16x64xf32, #tpu.memory_space<vmem>>, vector<16x64xf32>
    tpu.vector_store %arg7[%c0_14, %c0_15], %12 {strides = array<i32>} : memref<16x64xf32, #tpu.memory_space<vmem>>, vector<16x64xf32>,
    return
  }
}

module attributes {stable_mosaic.version = 11 : i64} {
  func.func @_ln_kernel(%arg0: memref<16x32xf32, #tpu.memory_space<vmem>>, %arg1: memref<1x32xf32, #tpu.memory_space<vmem>>, %arg2: memref<1x32xf32, #tpu.memory_space<vmem>>, %arg3: memref<16x32xf32, #tpu.memory_space<vmem>>) attributes {dimension_semantics = [], scalar_prefetch = 0 : i64, scratch_operands = 0 : i64, tpu.core_type = #tpu.core_type<tc>} {
    %c0 = arith.constant 0 : index
    %c0_0 = arith.constant 0 : index
    %0 = vector.load %arg0[%c0, %c0_0] : memref<16x32xf32, #tpu.memory_space<vmem>>, vector<16x32xf32>
    %c0_1 = arith.constant 0 : index
    %c0_2 = arith.constant 0 : index
    %1 = vector.load %arg1[%c0_1, %c0_2] : memref<1x32xf32, #tpu.memory_space<vmem>>, vector<1x32xf32>
    %c0_3 = arith.constant 0 : index
    %c0_4 = arith.constant 0 : index
    %2 = vector.load %arg2[%c0_3, %c0_4] : memref<1x32xf32, #tpu.memory_space<vmem>>, vector<1x32xf32>
    %cst = arith.constant dense<0.000000e+00> : vector<16xf32>
    %3 = vector.multi_reduction <add>, %0, %cst [1] : vector<16x32xf32> to vector<16xf32>
    %4 = vector.shape_cast %3 : vector<16xf32> to vector<16x1xf32>
    %cst_5 = arith.constant 3.200000e+01 : f32
    %5 = vector.broadcast %cst_5 : f32 to vector<16x1xf32>
    %6 = arith.divf %4, %5 : vector<16x1xf32>
    %7 = vector.broadcast %6 : vector<16x1xf32> to vector<16x32xf32>
    %8 = arith.subf %0, %7 : vector<16x32xf32>
    %9 = arith.mulf %8, %8 : vector<16x32xf32>
    %cst_6 = arith.constant dense<0.000000e+00> : vector<16xf32>
    %10 = vector.multi_reduction <add>, %9, %cst_6 [1] : vector<16x32xf32> to vector<16xf32>
    %11 = vector.shape_cast %10 : vector<16xf32> to vector<16x1xf32>
    %cst_7 = arith.constant 3.200000e+01 : f32
    %12 = vector.broadcast %cst_7 : f32 to vector<16x1xf32>
    %13 = arith.divf %11, %12 : vector<16x1xf32>
    %14 = vector.broadcast %6 : vector<16x1xf32> to vector<16x32xf32>
    %15 = arith.subf %0, %14 : vector<16x32xf32>
    %cst_8 = arith.constant 9.99999974E-6 : f32
    %16 = vector.broadcast %cst_8 : f32 to vector<16x1xf32>
    %17 = arith.addf %13, %16 : vector<16x1xf32>
    %18 = math.rsqrt %17 : vector<16x1xf32>
    %19 = vector.broadcast %18 : vector<16x1xf32> to vector<16x32xf32>
    %20 = arith.mulf %15, %19 : vector<16x32xf32>
    %21 = vector.broadcast %1 : vector<1x32xf32> to vector<16x32xf32>
    %22 = arith.mulf %20, %21 : vector<16x32xf32>
    %23 = vector.broadcast %2 : vector<1x32xf32> to vector<16x32xf32>
    %24 = arith.addf %22, %23 : vector<16x32xf32>
    %c0_9 = arith.constant 0 : index
    %c0_10 = arith.constant 0 : index
    %25 = vector.load %arg3[%c0_9, %c0_10] : memref<16x32xf32, #tpu.memory_space<vmem>>, vector<16x32xf32>
    tpu.vector_store %arg3[%c0_9, %c0_10], %24 {strides = array<i32>} : memref<16x32xf32, #tpu.memory_space<vmem>>, vector<16x32xf32>,
    return
  }
}

module attributes {stable_mosaic.version = 11 : i64} {
  func.func @_ln_out_kernel(%arg0: memref<16x32xf32, #tpu.memory_space<vmem>>, %arg1: memref<1x32xf32, #tpu.memory_space<vmem>>, %arg2: memref<1x32xf32, #tpu.memory_space<vmem>>, %arg3: memref<32x1xf32, #tpu.memory_space<vmem>>, %arg4: memref<1x1xf32, #tpu.memory_space<vmem>>, %arg5: memref<16x1xf32, #tpu.memory_space<vmem>>) attributes {dimension_semantics = [], scalar_prefetch = 0 : i64, scratch_operands = 0 : i64, tpu.core_type = #tpu.core_type<tc>} {
    %c0 = arith.constant 0 : index
    %c0_0 = arith.constant 0 : index
    %0 = vector.load %arg0[%c0, %c0_0] : memref<16x32xf32, #tpu.memory_space<vmem>>, vector<16x32xf32>
    %c0_1 = arith.constant 0 : index
    %c0_2 = arith.constant 0 : index
    %1 = vector.load %arg1[%c0_1, %c0_2] : memref<1x32xf32, #tpu.memory_space<vmem>>, vector<1x32xf32>
    %c0_3 = arith.constant 0 : index
    %c0_4 = arith.constant 0 : index
    %2 = vector.load %arg2[%c0_3, %c0_4] : memref<1x32xf32, #tpu.memory_space<vmem>>, vector<1x32xf32>
    %cst = arith.constant dense<0.000000e+00> : vector<16xf32>
    %3 = vector.multi_reduction <add>, %0, %cst [1] : vector<16x32xf32> to vector<16xf32>
    %4 = vector.shape_cast %3 : vector<16xf32> to vector<16x1xf32>
    %cst_5 = arith.constant 3.200000e+01 : f32
    %5 = vector.broadcast %cst_5 : f32 to vector<16x1xf32>
    %6 = arith.divf %4, %5 : vector<16x1xf32>
    %7 = vector.broadcast %6 : vector<16x1xf32> to vector<16x32xf32>
    %8 = arith.subf %0, %7 : vector<16x32xf32>
    %9 = arith.mulf %8, %8 : vector<16x32xf32>
    %cst_6 = arith.constant dense<0.000000e+00> : vector<16xf32>
    %10 = vector.multi_reduction <add>, %9, %cst_6 [1] : vector<16x32xf32> to vector<16xf32>
    %11 = vector.shape_cast %10 : vector<16xf32> to vector<16x1xf32>
    %cst_7 = arith.constant 3.200000e+01 : f32
    %12 = vector.broadcast %cst_7 : f32 to vector<16x1xf32>
    %13 = arith.divf %11, %12 : vector<16x1xf32>
    %14 = vector.broadcast %6 : vector<16x1xf32> to vector<16x32xf32>
    %15 = arith.subf %0, %14 : vector<16x32xf32>
    %cst_8 = arith.constant 9.99999974E-6 : f32
    %16 = vector.broadcast %cst_8 : f32 to vector<16x1xf32>
    %17 = arith.addf %13, %16 : vector<16x1xf32>
    %18 = math.rsqrt %17 : vector<16x1xf32>
    %19 = vector.broadcast %18 : vector<16x1xf32> to vector<16x32xf32>
    %20 = arith.mulf %15, %19 : vector<16x32xf32>
    %21 = vector.broadcast %1 : vector<1x32xf32> to vector<16x32xf32>
    %22 = arith.mulf %20, %21 : vector<16x32xf32>
    %23 = vector.broadcast %2 : vector<1x32xf32> to vector<16x32xf32>
    %24 = arith.addf %22, %23 : vector<16x32xf32>
    %c0_9 = arith.constant 0 : index
    %c0_10 = arith.constant 0 : index
    %25 = vector.load %arg3[%c0_9, %c0_10] : memref<32x1xf32, #tpu.memory_space<vmem>>, vector<32x1xf32>
    %cst_11 = arith.constant dense<0.000000e+00> : vector<16x1xf32>
    %26 = tpu.matmul %24, %25, %cst_11 {dimension_numbers = #tpu.dot_dimension_numbers<[1], [0], [0], [1], [0, 0, 1, 1], [], []>} : vector<16x32xf32>, vector<32x1xf32>, vector<16x1xf32> -> vector<16x1xf32>
    %c0_12 = arith.constant 0 : index
    %c0_13 = arith.constant 0 : index
    %27 = vector.load %arg4[%c0_12, %c0_13] : memref<1x1xf32, #tpu.memory_space<vmem>>, vector<1x1xf32>
    %28 = vector.broadcast %27 : vector<1x1xf32> to vector<16x1xf32>
    %29 = arith.addf %26, %28 : vector<16x1xf32>
    %c0_14 = arith.constant 0 : index
    %c0_15 = arith.constant 0 : index
    %30 = vector.load %arg5[%c0_14, %c0_15] : memref<16x1xf32, #tpu.memory_space<vmem>>, vector<16x1xf32>
    tpu.vector_store %arg5[%c0_14, %c0_15], %29 {strides = array<i32>} : memref<16x1xf32, #tpu.memory_space<vmem>>, vector<16x1xf32>,
    return
  }
}

</mosaic_0001>

<bundles_post_ra>
// kernel: time_series_transformer_forward.26
= control target key start
LH: loop header
LB: loop body
LE: loop exit
PB: predicated region body
PF: predicated region fallthrough
CT: control target
= control target key end

     0   :  { %vm27_vm0 = vcmask 261120   ;;  %vm109_vm1 = vcmask 785408   ;;  %s185_s1 = inlined_call_operand.vmem [shape: f32[32,96], index: 1, kind: input, shape index: {}]   ;;  %s186_s0 = inlined_call_operand.vmem [shape: f32[16,32], index: 0, kind: input, shape index: {}]   ;;  %s187_s2 = inlined_call_operand.vmem [shape: f32[1,96], index: 2, kind: input, shape index: {}]   ;;  %s188_s3 = inlined_call_operand.vmem [shape: f32[16,96], index: 3, kind: output, shape index: {}]  }
   0x1   :  { %v19_v0 = vld [vmem:[%s185_s1 + $0x18] sm:$0xff]  ;;  %v18_v1 = vld [vmem:[%s185_s1 + $0x10] sm:$0xff]  ;;  %v14_v2 = vld [vmem:[%s186_s0] sm:$0xff] }
   0x2   :  { %125 = vmatprep.subr.mxu0 %v19_v0  ;;  %v17_v3 = vld [vmem:[%s185_s1 + $0x8] sm:$0xff]  ;;  %133 = vmatprep.mubr.msk.f32.mxu0 %vm27_vm0, %v14_v2  ;;  %v16_v4 = vld [vmem:[%s185_s1] sm:$0xff] }
   0x3   :  { %126 = vmatpush3.msra.mxu0 %v19_v0  ;;  %v15_v5 = vld [vmem:[%s186_s0 + $0x8] sm:$0xff]  ;;  %v116_v6 = vld [vmem:[%s187_s2] ss:$0 sm:$0xff] }
   0x4   :  { %127 = vmatprep.subr.mxu0 %v18_v1 }
   0x5   :  { %128 = vmatpush3.msra.mxu0 %v18_v1 }
   0x6   :  { %129 = vmatprep.subr.mxu0 %v17_v3 }
   0x7   :  { %130 = vmatpush3.msra.mxu0 %v17_v3 }
   0x8   :  { %131 = vmatprep.subr.mxu0 %v16_v4 }
   0x9   :  { %132 = vmatpush3.msra.mxu0 %v16_v4 }
   0xa   :  { %134 = vmatmul.mubr.msk.f32.vlgmr.msra.gmra.mxu0 %vm27_vm0, %v15_v5 }
  0xca   :  { %v135_v7 = vpop.f32.mrf.mxu0 }
  0xcb   :  { %v106_v8 = vadd.f32 %v135_v7, %v116_v6 }
  0xcc   :  { %v100_v9 = vpop.f32.mrf.mxu0 }
  0xcd   :  { %111 = vst.msk [vmem:[%s188_s3 + $0x8] sm:$0xff] %vm109_vm1, %v106_v8  ;;  %v101_v10 = vadd.f32 %v116_v6, %v100_v9 }
  0xcf   :  { %110 = vst.msk [vmem:[%s188_s3] sm:$0xff] %vm109_vm1, %v101_v10 }

// kernel: time_series_transformer_forward.25
= control target key start
LH: loop header
LB: loop body
LE: loop exit
PB: predicated region body
PF: predicated region fallthrough
CT: control target
= control target key end

     0   :  { %vm34_vm0 = vcmask 1043456   ;;  %vm27_vm1 = vcmask 31744   ;;  %vm117_vm2 = vcmask 261120   ;;  %s185_s1 = inlined_call_operand.vmem [shape: f32[4,32], index: 1, kind: input, shape index: {}]   ;;  %s186_s0 = inlined_call_operand.vmem [shape: f32[16,4], index: 0, kind: input, shape index: {}]   ;;  %s187_s2 = inlined_call_operand.vmem [shape: f32[1,32], index: 2, kind: input, shape index: {}]   ;;  %s188_s3 = inlined_call_operand.vmem [shape: f32[16,32], index: 3, kind: input, shape index: {}]   ;;  %s189_s4 = inlined_call_operand.vmem [shape: f32[16,32], index: 4, kind: output, shape index: {}]  }
   0x1   :  { %v19_v0 = vld [vmem:[%s185_s1] sm:$0xf]  ;;  %v18_v2 = vld [vmem:[%s186_s0 + $0x8] sm:$0xff] }
   0x2   :  { %v17_v1 = vld [vmem:[%s186_s0] sm:$0xff]  ;;  %131 = vmatprep.subr.msk.mxu0 %vm34_vm0, %v19_v0  ;;  %v114_v5 = vld [vmem:[%s188_s3 + $0x8] sm:$0xff] }
   0x3   :  { %133 = vmatprep.mubr.msk.f32.mxu0 %vm27_vm1, %v17_v1  ;;  %132 = vmatpush3.msk.msra.mxu0 %vm34_vm0, %v19_v0  ;;  %v124_v3 = vld [vmem:[%s187_s2] ss:$0 sm:$0xff] }
   0x4   :  { %134 = vmatmul.mubr.msk.f32.vlgmr.msra.gmra.mxu0 %vm27_vm1, %v18_v2  ;;  %v113_v8 = vld [vmem:[%s188_s3] sm:$0xff] }
  0xc4   :  { %v135_v4 = vpop.f32.mrf.mxu0 }
  0xc5   :  { %v110_v6 = vadd.f32 %v135_v4, %v124_v3 }
  0xc6   :  { %v104_v7 = vpop.f32.mrf.mxu0 }
  0xc7   :  { %v116_v9 = vadd.f32 %v114_v5, %v110_v6  ;;  %v105_v10 = vadd.f32 %v124_v3, %v104_v7 }
  0xc9   :  { %119 = vst.msk [vmem:[%s189_s4 + $0x8] sm:$0xff] %vm117_vm2, %v116_v9  ;;  %v115_v11 = vadd.f32 %v113_v8, %v105_v10 }
  0xcb   :  { %118 = vst.msk [vmem:[%s189_s4] sm:$0xff] %vm117_vm2, %v115_v11 }

// kernel: time_series_transformer_forward.28
= control target key start
LH: loop header
LB: loop body
LE: loop exit
PB: predicated region body
PF: predicated region fallthrough
CT: control target
= control target key end

     0   :  { %vm36_vm0 = vcmask 261120   ;;  %s281_s1 = inlined_call_operand.vmem [shape: f32[32,32], index: 1, kind: input, shape index: {}]   ;;  %s282_s0 = inlined_call_operand.vmem [shape: f32[16,32], index: 0, kind: input, shape index: {}]   ;;  %s283_s2 = inlined_call_operand.vmem [shape: f32[1,32], index: 2, kind: input, shape index: {}]   ;;  %s284_s3 = inlined_call_operand.vmem [shape: f32[16,32], index: 3, kind: input, shape index: {}]   ;;  %s285_s4 = inlined_call_operand.vmem [shape: f32[1,32], index: 4, kind: input, shape index: {}]   ;;  %s286_s5 = inlined_call_operand.vmem [shape: f32[1,32], index: 5, kind: input, shape index: {}]   ;;  %s287_s6 = inlined_call_operand.vmem [shape: f32[16,32], index: 6, kind: output, shape index: {}]  }
   0x1   :  { %v28_v0 = vld [vmem:[%s281_s1 + $0x18] sm:$0xff]  ;;  %v27_v1 = vld [vmem:[%s281_s1 + $0x10] sm:$0xff]  ;;  %v23_v2 = vld [vmem:[%s282_s0] sm:$0xff] }
   0x2   :  { %184 = vmatprep.subr.mxu0 %v28_v0  ;;  %v26_v3 = vld [vmem:[%s281_s1 + $0x8] sm:$0xff]  ;;  %192 = vmatprep.mubr.msk.f32.mxu0 %vm36_vm0, %v23_v2  ;;  %v25_v4 = vld [vmem:[%s281_s1] sm:$0xff] }
   0x3   :  { %185 = vmatpush3.msra.mxu0 %v28_v0  ;;  %v24_v5 = vld [vmem:[%s282_s0 + $0x8] sm:$0xff]  ;;  %v173_v7 = vld [vmem:[%s283_s2] ss:$0 sm:$0xff] }
   0x4   :  { %186 = vmatprep.subr.mxu0 %v27_v1  ;;  %v118_v9 = vld [vmem:[%s284_s3] sm:$0xff]  ;;  %v119_v12 = vld [vmem:[%s284_s3 + $0x8] sm:$0xff] }
   0x5   :  { %187 = vmatpush3.msra.mxu0 %v27_v1  ;;  %v176_v34 = vld [vmem:[%s285_s4] ss:$0 sm:$0xff] }
   0x6   :  { %188 = vmatprep.subr.mxu0 %v26_v3  ;;  %v177_v36 = vld [vmem:[%s286_s5] ss:$0 sm:$0xff] }
   0x7   :  { %189 = vmatpush3.msra.mxu0 %v26_v3 }
   0x8   :  { %190 = vmatprep.subr.mxu0 %v25_v4 }
   0x9   :  { %191 = vmatpush3.msra.mxu0 %v25_v4 }
   0xa   :  { %193 = vmatmul.mubr.msk.f32.vlgmr.msra.gmra.mxu0 %vm36_vm0, %v24_v5 }
  0xca   :  { %v194_v6 = vpop.f32.mrf.mxu0 }
  0xcb   :  { %v115_v10 = vadd.f32 %v194_v6, %v173_v7 }
  0xcc   :  { %v109_v8 = vpop.f32.mrf.mxu0 }
  0xcd   :  { %v110_v11 = vadd.f32 %v173_v7, %v109_v8  ;;  %v121_v15 = vadd.f32 %v119_v12, %v115_v10 }
  0xcf   :  { %v120_v13 = vadd.f32 %v118_v9, %v110_v11  ;;  %v127_v16 = vsel %vm36_vm0, %v121_v15, 0.0 }
  0xd1   :  { %v124_v14 = vsel %vm36_vm0, %v120_v13, 0.0 }
  0xd2   :  { %125 = vadd.xlane.f32.xlu0 %v124_v14 }
  0xd6   :  { %128 = vadd.xlane.f32.xlu0 %v127_v16 }
 0x15b   :  { %v126_v17 = vpop.xlane.xlu0 %125 }
 0x15c   :  { %v131_v18 = vmul.f32 0.03125, %v126_v17 }
 0x15e   :  { %v133_v19 = vsub.f32 %v120_v13, %v131_v18 }
 0x15f   :  { %v129_v20 = vpop.xlane.xlu0 %128 }
 0x160   :  { %v132_v21 = vmul.f32 0.03125, %v129_v20  ;;  %v135_v22 = vmul.f32 %v133_v19, %v133_v19 }
 0x162   :  { %v134_v23 = vsub.f32 %v121_v15, %v132_v21  ;;  %v137_v24 = vsel %vm36_vm0, %v135_v22, 0.0 }
 0x163   :  { %138 = vadd.xlane.f32.xlu1 %v137_v24 }
 0x164   :  { %v136_v25 = vmul.f32 %v134_v23, %v134_v23 }
 0x166   :  { %v140_v26 = vsel %vm36_vm0, %v136_v25, 0.0 }
 0x167   :  { %141 = vadd.xlane.f32.xlu1 %v140_v26 }
 0x1ec   :  { %v139_v27 = vpop.xlane.xlu1 %138 }
 0x1ed   :  { %v143_v28 = vmul.f32 0.03125, %v139_v27 }
 0x1ef   :  { %v145_v29 = vadd.f32 1e-05, %v143_v28 }
 0x1f0   :  { %v142_v30 = vpop.xlane.xlu1 %141 }
 0x1f1   :  { %195 = vrsqrt.f32 %v145_v29  ;;  %v144_v31 = vmul.f32 0.03125, %v142_v30 }
 0x1f3   :  { %v146_v32 = vadd.f32 1e-05, %v144_v31 }
 0x1f5   :  { %197 = vrsqrt.f32 %v146_v32 }
 0x1fe   :  { %v196_v33 = vpop.eup %195 }
 0x1ff   :  { %v149_v35 = vmul.f32 %v196_v33, %v133_v19 }
 0x201   :  { %v157_v37 = vmul.f32 %v176_v34, %v149_v35 }
 0x202   :  { %v198_v38 = vpop.eup %197 }
 0x203   :  { %v165_v39 = vadd.f32 %v177_v36, %v157_v37  ;;  %v150_v40 = vmul.f32 %v198_v38, %v134_v23 }
 0x205   :  { %167 = vst.msk [vmem:[%s287_s6] sm:$0xff] %vm36_vm0, %v165_v39  ;;  %v158_v41 = vmul.f32 %v176_v34, %v150_v40 }
 0x207   :  { %v166_v42 = vadd.f32 %v177_v36, %v158_v41 }
 0x209   :  { %168 = vst.msk [vmem:[%s287_s6 + $0x8] sm:$0xff] %vm36_vm0, %v166_v42 }

// kernel: time_series_transformer_forward.38
= control target key start
LH: loop header
LB: loop body
LE: loop exit
PB: predicated region body
PF: predicated region fallthrough
CT: control target
= control target key end

     0   :  { %vm38_vm0 = vcmask 261120   ;;  %vm216_vm1 = vcmask 523264   ;;  %s367_s2 = inlined_call_operand.vmem [shape: f32[32,32], index: 2, kind: input, shape index: {}]   ;;  %s368_s4 = inlined_call_operand.vmem [shape: f32[32,64], index: 4, kind: input, shape index: {}]   ;;  %s369_s0 = inlined_call_operand.vmem [shape: f32[16,32], index: 0, kind: input, shape index: {}]   ;;  %s370_s1 = inlined_call_operand.vmem [shape: f32[16,32], index: 1, kind: input, shape index: {}]   ;;  %s371_s3 = inlined_call_operand.vmem [shape: f32[1,32], index: 3, kind: input, shape index: {}]   ;;  %s372_s5 = inlined_call_operand.vmem [shape: f32[1,64], index: 5, kind: input, shape index: {}]   ;;  %s373_s6 = inlined_call_operand.vmem [shape: f32[16,32], index: 6, kind: output, shape index: {0}]   ;;  %s374_s7 = inlined_call_operand.vmem [shape: f32[16,64], index: 7, kind: output, shape index: {1}]  }
   0x1   :  { %v30_v0 = vld [vmem:[%s367_s2 + $0x18] sm:$0xff]  ;;  %v29_v2 = vld [vmem:[%s367_s2 + $0x10] sm:$0xff]  ;;  %v28_v4 = vld [vmem:[%s367_s2 + $0x8] sm:$0xff] }
   0x2   :  { %v127_v1 = vld [vmem:[%s368_s4 + $0x18] sm:$0xff]  ;;  %245 = vmatprep.subr.mxu0 %v30_v0  ;;  %v126_v3 = vld [vmem:[%s368_s4 + $0x10] sm:$0xff]  ;;  %v125_v5 = vld [vmem:[%s368_s4 + $0x8] sm:$0xff] }
   0x3   :  { %256 = vmatprep.subr.mxu1 %v127_v1  ;;  %246 = vmatpush3.msra.mxu0 %v30_v0  ;;  %v27_v6 = vld [vmem:[%s367_s2] sm:$0xff]  ;;  %v26_v10 = vld [vmem:[%s369_s0 + $0x8] sm:$0xff] }
   0x4   :  { %257 = vmatpush3.msra.mxu1 %v127_v1  ;;  %247 = vmatprep.subr.mxu0 %v29_v2  ;;  %v124_v7 = vld [vmem:[%s368_s4] sm:$0xff]  ;;  %v123_v11 = vld [vmem:[%s370_s1 + $0x8] sm:$0xff] }
   0x5   :  { %258 = vmatprep.subr.mxu1 %v126_v3  ;;  %248 = vmatpush3.msra.mxu0 %v29_v2  ;;  %v25_v8 = vld [vmem:[%s369_s0] sm:$0xff] }
   0x6   :  { %259 = vmatpush3.msra.mxu1 %v126_v3  ;;  %249 = vmatprep.subr.mxu0 %v28_v4  ;;  %v122_v9 = vld [vmem:[%s370_s1] sm:$0xff] }
   0x7   :  { %260 = vmatprep.subr.mxu1 %v125_v5  ;;  %250 = vmatpush3.msra.mxu0 %v28_v4  ;;  %v227_v12 = vld [vmem:[%s371_s3] ss:$0 sm:$0xff] }
   0x8   :  { %261 = vmatpush3.msra.mxu1 %v125_v5  ;;  %251 = vmatprep.subr.mxu0 %v27_v6  ;;  %v230_v13 = vld [vmem:[%s372_s5] ss:$0 sm:$0xff] }
   0x9   :  { %262 = vmatprep.subr.mxu1 %v124_v7  ;;  %252 = vmatpush3.msra.mxu0 %v27_v6 }
   0xa   :  { %253 = vmatprep.mubr.msk.f32.mxu0 %vm38_vm0, %v25_v8  ;;  %263 = vmatpush3.msra.mxu1 %v124_v7 }
   0xb   :  { %264 = vmatprep.mubr.msk.f32.mxu1 %vm38_vm0, %v122_v9  ;;  %254 = vmatmul.mubr.msk.f32.vlgmr.msra.gmra.mxu0 %vm38_vm0, %v26_v10 }
   0xc   :  { %265 = vmatmul.mubr.msk.f32.vlgmr.msra.gmra.mxu1 %vm38_vm0, %v123_v11 }
  0xcb   :  { %v255_v14 = vpop.f32.mrf.mxu0 }
  0xcc   :  { %v266_v15 = vpop.f32.mrf.mxu1  ;;  %v117_v16 = vadd.f32 %v255_v14, %v227_v12 }
  0xcd   :  { %v213_v17 = vadd.f32 %v266_v15, %v230_v13  ;;  %v111_v18 = vpop.f32.mrf.mxu0 }
  0xce   :  { %v207_v19 = vpop.f32.mrf.mxu1  ;;  %121 = vst.msk [vmem:[%s373_s6 + $0x8] sm:$0xff] %vm38_vm0, %v117_v16  ;;  %v112_v20 = vadd.f32 %v227_v12, %v111_v18 }
  0xcf   :  { %218 = vst.msk [vmem:[%s374_s7 + $0x8] sm:$0xff] %vm216_vm1, %v213_v17  ;;  %v208_v21 = vadd.f32 %v230_v13, %v207_v19 }
  0xd0   :  { %120 = vst.msk [vmem:[%s373_s6] sm:$0xff] %vm38_vm0, %v112_v20 }
  0xd1   :  { %217 = vst.msk [vmem:[%s374_s7] sm:$0xff] %vm216_vm1, %v208_v21 }

// kernel: time_series_transformer_forward.27
= control target key start
LH: loop header
LB: loop body
LE: loop exit
PB: predicated region body
PF: predicated region fallthrough
CT: control target
= control target key end

     0   :  { %vm38_vm0 = vcmask 64512   ;;  %v1509_v0 = vmov 0.0   ;;  %vm1510_vm1 = vmmov 0   ;;  %s1735_s1 = inlined_call_operand.vmem [shape: f32[8,8,8], index: 1, kind: input, shape index: {}]   ;;  %s1736_s0 = inlined_call_operand.vmem [shape: f32[8,8,8], index: 0, kind: input, shape index: {}]   ;;  %s1737_s2 = inlined_call_operand.vmem [shape: f32[8,8,8], index: 2, kind: input, shape index: {}]   ;;  %s1738_s3 = inlined_call_operand.vmem [shape: f32[8,8,8], index: 3, kind: output, shape index: {}]  }
   0x1   :  { %1395 = vmatprep.subr.mxu0 %v1509_v0  ;;  %v22_v1 = vld [vmem:[%s1735_s1] sm:$0xff]  ;;  %1397 = vmatprep.mubr.msk.f32.mxu0 %vm1510_vm1, %v1509_v0  ;;  %v23_v2 = vld [vmem:[%s1735_s1 + $0x8] sm:$0xff]  ;;  %v24_v4 = vld [vmem:[%s1735_s1 + $0x10] sm:$0xff] }
   0x2   :  { %1396 = vmatpush3.xpose.msk.msra.mxu0 %vm38_vm0, %v22_v1  ;;  %1400 = vmatprep.subr.mxu1 %v1509_v0  ;;  %v14_v3 = vld [vmem:[%s1736_s0] sm:$0xff]  ;;  %v15_v5 = vld [vmem:[%s1736_s0 + $0x8] sm:$0xff]  ;;  %v25_v6 = vld [vmem:[%s1735_s1 + $0x18] sm:$0xff] }
   0x3   :  { %1401 = vmatpush3.xpose.msk.msra.mxu1 %vm38_vm0, %v23_v2  ;;  %1405 = vmatprep.subr.mxu0 %v1509_v0  ;;  %v16_v7 = vld [vmem:[%s1736_s0 + $0x10] sm:$0xff]  ;;  %v26_v8 = vld [vmem:[%s1735_s1 + $0x20] sm:$0xff]  ;;  %v17_v9 = vld [vmem:[%s1736_s0 + $0x18] sm:$0xff] }
   0x4   :  { %1402 = vmatprep.mubr.msk.f32.mxu1 %vm1510_vm1, %v1509_v0  ;;  %1410 = vmatprep.subr.mxu1 %v1509_v0  ;;  %v27_v10 = vld [vmem:[%s1735_s1 + $0x28] sm:$0xff]  ;;  %v18_v11 = vld [vmem:[%s1736_s0 + $0x20] sm:$0xff]  ;;  %v28_v12 = vld [vmem:[%s1735_s1 + $0x30] sm:$0xff] }
   0x5   :  { %1398 = vmatmul.mubr.msk.f32.vlgmr.msra.gmra.mxu0 %vm38_vm0, %v14_v3  ;;  %v19_v13 = vld [vmem:[%s1736_s0 + $0x28] sm:$0xff]  ;;  %v29_v14 = vld [vmem:[%s1735_s1 + $0x38] sm:$0xff]  ;;  %v20_v15 = vld [vmem:[%s1736_s0 + $0x30] sm:$0xff] }
   0x6   :  { %1406 = vmatpush3.xpose.msk.msra.mxu0 %vm38_vm0, %v24_v4  ;;  %1403 = vmatmul.mubr.msk.f32.vlgmr.msra.gmra.mxu1 %vm38_vm0, %v15_v5  ;;  %v21_v16 = vld [vmem:[%s1736_s0 + $0x38] sm:$0xff] }
   0x7   :  { %1407 = vmatprep.mubr.msk.f32.mxu0 %vm1510_vm1, %v1509_v0  ;;  %1411 = vmatpush3.xpose.msk.msra.mxu1 %vm38_vm0, %v25_v6 }
   0x8   :  { %1415 = vmatprep.subr.mxu0 %v1509_v0  ;;  %1412 = vmatprep.mubr.msk.f32.mxu1 %vm1510_vm1, %v1509_v0 }
   0x9   :  { %1408 = vmatmul.mubr.msk.f32.vlgmr.msra.gmra.mxu0 %vm38_vm0, %v16_v7  ;;  %1420 = vmatprep.subr.mxu1 %v1509_v0 }
   0xa   :  { %1416 = vmatpush3.xpose.msk.msra.mxu0 %vm38_vm0, %v26_v8  ;;  %1413 = vmatmul.mubr.msk.f32.vlgmr.msra.gmra.mxu1 %vm38_vm0, %v17_v9 }
   0xb   :  { %1417 = vmatprep.mubr.msk.f32.mxu0 %vm1510_vm1, %v1509_v0  ;;  %1421 = vmatpush3.xpose.msk.msra.mxu1 %vm38_vm0, %v27_v10 }
   0xc   :  { %1425 = vmatprep.subr.mxu0 %v1509_v0  ;;  %1422 = vmatprep.mubr.msk.f32.mxu1 %vm1510_vm1, %v1509_v0 }
   0xd   :  { %1418 = vmatmul.mubr.msk.f32.vlgmr.msra.gmra.mxu0 %vm38_vm0, %v18_v11  ;;  %1430 = vmatprep.subr.mxu1 %v1509_v0 }
   0xe   :  { %1426 = vmatpush3.xpose.msk.msra.mxu0 %vm38_vm0, %v28_v12  ;;  %1423 = vmatmul.mubr.msk.f32.vlgmr.msra.gmra.mxu1 %vm38_vm0, %v19_v13 }
   0xf   :  { %1427 = vmatprep.mubr.msk.f32.mxu0 %vm1510_vm1, %v1509_v0  ;;  %1431 = vmatpush3.xpose.msk.msra.mxu1 %vm38_vm0, %v29_v14 }
  0x10   :  { %1432 = vmatprep.mubr.msk.f32.mxu1 %vm1510_vm1, %v1509_v0  ;;  %1435 = vmatprep.subr.mxu0 %v1509_v0 }
  0x11   :  { %1428 = vmatmul.mubr.msk.f32.vlgmr.msra.gmra.mxu0 %vm38_vm0, %v20_v15  ;;  %1440 = vmatprep.subr.mxu1 %v1509_v0 }
  0x12   :  { %1433 = vmatmul.mubr.msk.f32.vlgmr.msra.gmra.mxu1 %vm38_vm0, %v21_v16  ;;  %1437 = vmatprep.mubr.msk.f32.mxu0 %vm1510_vm1, %v1509_v0 }
  0x13   :  { %1442 = vmatprep.mubr.msk.f32.mxu1 %vm1510_vm1, %v1509_v0 }
  0xc5   :  { %v111_v17 = vpop.f32.mrf.mxu0 }
  0xc6   :  { %v647_v18 = vmul.f32 0.35355338, %v111_v17  ;;  %v187_v19 = vpop.f32.mrf.mxu1 }
  0xc7   :  { %v1399_v20 = vpop.f32.mrf.mxu0  ;;  %v648_v21 = vmul.f32 0.35355338, %v187_v19 }
  0xc8   :  { %v655_v22 = vsel %vm38_vm0, %v647_v18, -inf  ;;  %v1404_v23 = vpop.f32.mrf.mxu1 }
  0xc9   :  { %656 = vmax.xlane.f32.xlu0 %v655_v22  ;;  %v263_v24 = vpop.f32.mrf.mxu0  ;;  %v658_v27 = vsel %vm38_vm0, %v648_v21, -inf }
  0xca   :  { %v649_v25 = vmul.f32 0.35355338, %v263_v24  ;;  %v339_v26 = vpop.f32.mrf.mxu1 }
  0xcb   :  { %v1409_v28 = vpop.f32.mrf.mxu0  ;;  %v650_v29 = vmul.f32 0.35355338, %v339_v26  ;;  %v30_v26 = vld [vmem:[%s1737_s2] sm:$0xff] }
  0xcc   :  { %v661_v30 = vsel %vm38_vm0, %v649_v25, -inf  ;;  %v1414_v31 = vpop.f32.mrf.mxu1  ;;  %1436 = vmatpush3.msra.mxu0 %v30_v26 }
  0xcd   :  { %659 = vmax.xlane.f32.xlu0 %v658_v27  ;;  %662 = vmax.xlane.f32.xlu1 %v661_v30  ;;  %v415_v32 = vpop.f32.mrf.mxu0  ;;  %v664_v35 = vsel %vm38_vm0, %v650_v29, -inf  ;;  %v31_v27 = vld [vmem:[%s1737_s2 + $0x8] sm:$0xff] }
  0xce   :  { %v651_v33 = vmul.f32 0.35355338, %v415_v32  ;;  %v491_v34 = vpop.f32.mrf.mxu1  ;;  %1445 = vmatprep.subr.mxu0 %v1509_v0  ;;  %1441 = vmatpush3.msra.mxu1 %v31_v27 }
  0xcf   :  { %v1419_v36 = vpop.f32.mrf.mxu0  ;;  %v652_v37 = vmul.f32 0.35355338, %v491_v34  ;;  %1450 = vmatprep.subr.mxu1 %v1509_v0 }
  0xd0   :  { %v667_v38 = vsel %vm38_vm0, %v651_v33, -inf  ;;  %v1424_v39 = vpop.f32.mrf.mxu1 }
  0xd1   :  { %665 = vmax.xlane.f32.xlu1 %v664_v35  ;;  %668 = vmax.xlane.f32.xlu0 %v667_v38  ;;  %v567_v40 = vpop.f32.mrf.mxu0  ;;  %v670_v43 = vsel %vm38_vm0, %v652_v37, -inf }
  0xd2   :  { %v653_v41 = vmul.f32 0.35355338, %v567_v40  ;;  %v643_v42 = vpop.f32.mrf.mxu1 }
  0xd3   :  { %v654_v44 = vmul.f32 0.35355338, %v643_v42  ;;  %v1429_v45 = vpop.f32.mrf.mxu0  ;;  %v33_v42 = vld [vmem:[%s1737_s2 + $0x18] sm:$0xff] }
  0xd4   :  { %v673_v46 = vsel %vm38_vm0, %v653_v41, -inf  ;;  %v1434_v47 = vpop.f32.mrf.mxu1 }
  0xd5   :  { %671 = vmax.xlane.f32.xlu1 %v670_v43  ;;  %674 = vmax.xlane.f32.xlu0 %v673_v46  ;;  %v676_v48 = vsel %vm38_vm0, %v654_v44, -inf }
  0xd9   :  { %677 = vmax.xlane.f32.xlu1 %v676_v48  ;;  %v35_v48 = vld [vmem:[%s1737_s2 + $0x28] sm:$0xff] }
 0x152   :  { %v657_v49 = vpop.xlane.xlu0 %656 }
 0x153   :  { %v679_v50 = vsub.f32 %v647_v18, %v657_v49 }
 0x155   :  { %v687_v51 = vmul.f32 1.442695, %v679_v50  ;;  %v36_v50 = vld [vmem:[%s1737_s2 + $0x30] sm:$0xff] }
 0x156   :  { %v660_v52 = vpop.xlane.xlu0 %659  ;;  %v663_v53 = vpop.xlane.xlu1 %662 }
 0x157   :  { %1477 = vpow2.f32 %v687_v51  ;;  %v680_v54 = vsub.f32 %v648_v21, %v660_v52  ;;  %v681_v55 = vsub.f32 %v649_v25, %v663_v53 }
 0x159   :  { %v689_v56 = vmul.f32 1.442695, %v680_v54  ;;  %v691_v57 = vmul.f32 1.442695, %v681_v55  ;;  %v37_v54 = vld [vmem:[%s1737_s2 + $0x38] sm:$0xff] }
 0x15a   :  { %v666_v58 = vpop.xlane.xlu1 %665  ;;  %v669_v59 = vpop.xlane.xlu0 %668 }
 0x15b   :  { %1479 = vpow2.f32 %v689_v56  ;;  %v682_v60 = vsub.f32 %v650_v29, %v666_v58  ;;  %v683_v61 = vsub.f32 %v651_v33, %v669_v59 }
 0x15c   :  { %1481 = vpow2.f32 %v691_v57 }
 0x15d   :  { %v693_v62 = vmul.f32 1.442695, %v682_v60  ;;  %v695_v63 = vmul.f32 1.442695, %v683_v61 }
 0x15e   :  { %v672_v1 = vpop.xlane.xlu1 %671  ;;  %v675_v2 = vpop.xlane.xlu0 %674 }
 0x15f   :  { %1483 = vpow2.f32 %v693_v62  ;;  %v684_v3 = vsub.f32 %v652_v37, %v672_v1  ;;  %v685_v4 = vsub.f32 %v653_v41, %v675_v2  ;;  %v32_v37 = vld [vmem:[%s1737_s2 + $0x10] sm:$0xff] }
 0x160   :  { %1485 = vpow2.f32 %v695_v63 }
 0x161   :  { %v697_v5 = vmul.f32 1.442695, %v684_v3  ;;  %v699_v6 = vmul.f32 1.442695, %v685_v4 }
 0x162   :  { %v678_v7 = vpop.xlane.xlu1 %677 }
 0x163   :  { %1487 = vpow2.f32 %v697_v5  ;;  %v686_v8 = vsub.f32 %v654_v44, %v678_v7  ;;  %v34_v44 = vld [vmem:[%s1737_s2 + $0x20] sm:$0xff] }
 0x164   :  { %v1478_v9 = vpop.eup %1477  ;;  %1489 = vpow2.f32 %v699_v6 }
 0x165   :  { %v701_v10 = vmul.f32 1.442695, %v686_v8  ;;  %v703_v11 = vsel %vm38_vm0, %v1478_v9, 0.0 }
 0x166   :  { %704 = vadd.xlane.f32.xlu0 %v703_v11 }
 0x167   :  { %1491 = vpow2.f32 %v701_v10 }
 0x168   :  { %v1480_v12 = vpop.eup %1479 }
 0x169   :  { %v1482_v13 = vpop.eup %1481  ;;  %v706_v14 = vsel %vm38_vm0, %v1480_v12, 0.0 }
 0x16a   :  { %707 = vadd.xlane.f32.xlu1 %v706_v14  ;;  %v709_v15 = vsel %vm38_vm0, %v1482_v13, 0.0 }
 0x16b   :  { %710 = vadd.xlane.f32.xlu0 %v709_v15 }
 0x16c   :  { %v1484_v16 = vpop.eup %1483 }
 0x16d   :  { %v1486_v17 = vpop.eup %1485  ;;  %v712_v18 = vsel %vm38_vm0, %v1484_v16, 0.0 }
 0x16e   :  { %713 = vadd.xlane.f32.xlu1 %v712_v18  ;;  %v715_v19 = vsel %vm38_vm0, %v1486_v17, 0.0 }
 0x16f   :  { %716 = vadd.xlane.f32.xlu0 %v715_v19 }
 0x170   :  { %v1638_v20 = vpop.eup %1487 }
 0x171   :  { %v1640_v21 = vpop.eup %1489  ;;  %v718_v22 = vsel %vm38_vm0, %v1638_v20, 0.0 }
 0x172   :  { %719 = vadd.xlane.f32.xlu1 %v718_v22  ;;  %v721_v23 = vsel %vm38_vm0, %v1640_v21, 0.0 }
 0x173   :  { %722 = vadd.xlane.f32.xlu0 %v721_v23 }
 0x174   :  { %v1646_v24 = vpop.eup %1491 }
 0x175   :  { %v724_v25 = vsel %vm38_vm0, %v1646_v24, 0.0 }
 0x176   :  { %725 = vadd.xlane.f32.xlu1 %v724_v25 }
 0x1ef   :  { %v705_v28 = vpop.xlane.xlu0 %704 }
 0x1f0   :  { %1493 = vrcp.f32 %v705_v28 }
 0x1f3   :  { %v708_v29 = vpop.xlane.xlu1 %707 }
 0x1f4   :  { %1495 = vrcp.f32 %v708_v29  ;;  %v711_v30 = vpop.xlane.xlu0 %710 }
 0x1f5   :  { %1497 = vrcp.f32 %v711_v30 }
 0x1f7   :  { %v714_v31 = vpop.xlane.xlu1 %713 }
 0x1f8   :  { %1499 = vrcp.f32 %v714_v31  ;;  %v717_v32 = vpop.xlane.xlu0 %716 }
 0x1f9   :  { %1501 = vrcp.f32 %v717_v32 }
 0x1fb   :  { %v720_v33 = vpop.xlane.xlu1 %719 }
 0x1fc   :  { %1503 = vrcp.f32 %v720_v33  ;;  %v723_v34 = vpop.xlane.xlu0 %722 }
 0x1fd   :  { %v1494_v35 = vpop.eup %1493  ;;  %1505 = vrcp.f32 %v723_v34 }
 0x1fe   :  { %v735_v36 = vmul.f32 %v1494_v35, %v1478_v9 }
 0x1ff   :  { %v726_v38 = vpop.xlane.xlu1 %725 }
 0x200   :  { %1507 = vrcp.f32 %v726_v38  ;;  %1438 = vmatmul.mubr.msk.f32.vlgmr.msra.gmra.mxu0 %vm38_vm0, %v735_v36 }
 0x201   :  { %v1496_v39 = vpop.eup %1495  ;;  %1446 = vmatpush3.msra.mxu0 %v32_v37  ;;  %1447 = vmatprep.mubr.msk.f32.mxu0 %vm1510_vm1, %v1509_v0 }
 0x202   :  { %v1498_v40 = vpop.eup %1497  ;;  %v736_v41 = vmul.f32 %v1496_v39, %v1480_v12  ;;  %1455 = vmatprep.subr.mxu0 %v1509_v0 }
 0x203   :  { %v737_v43 = vmul.f32 %v1498_v40, %v1482_v13 }
 0x204   :  { %1443 = vmatmul.mubr.msk.f32.vlgmr.msra.gmra.mxu1 %vm38_vm0, %v736_v41 }
 0x205   :  { %v1500_v45 = vpop.eup %1499  ;;  %1448 = vmatmul.mubr.msk.f32.vlgmr.msra.gmra.mxu0 %vm38_vm0, %v737_v43  ;;  %1451 = vmatpush3.msra.mxu1 %v33_v42 }
 0x206   :  { %v1502_v46 = vpop.eup %1501  ;;  %1452 = vmatprep.mubr.msk.f32.mxu1 %vm1510_vm1, %v1509_v0  ;;  %1456 = vmatpush3.msra.mxu0 %v34_v44  ;;  %v738_v47 = vmul.f32 %v1500_v45, %v1484_v16 }
 0x207   :  { %1457 = vmatprep.mubr.msk.f32.mxu0 %vm1510_vm1, %v1509_v0  ;;  %v739_v49 = vmul.f32 %v1502_v46, %v1486_v17  ;;  %1460 = vmatprep.subr.mxu1 %v1509_v0 }
 0x208   :  { %1453 = vmatmul.mubr.msk.f32.vlgmr.msra.gmra.mxu1 %vm38_vm0, %v738_v47  ;;  %1465 = vmatprep.subr.mxu0 %v1509_v0 }
 0x209   :  { %v1504_v51 = vpop.eup %1503  ;;  %1458 = vmatmul.mubr.msk.f32.vlgmr.msra.gmra.mxu0 %vm38_vm0, %v739_v49  ;;  %1461 = vmatpush3.msra.mxu1 %v35_v48 }
 0x20a   :  { %v1506_v52 = vpop.eup %1505  ;;  %1462 = vmatprep.mubr.msk.f32.mxu1 %vm1510_vm1, %v1509_v0  ;;  %1466 = vmatpush3.msra.mxu0 %v36_v50  ;;  %v740_v53 = vmul.f32 %v1504_v51, %v1638_v20 }
 0x20b   :  { %1467 = vmatprep.mubr.msk.f32.mxu0 %vm1510_vm1, %v1509_v0  ;;  %v741_v55 = vmul.f32 %v1506_v52, %v1640_v21  ;;  %1470 = vmatprep.subr.mxu1 %v1509_v0 }
 0x20c   :  { %1463 = vmatmul.mubr.msk.f32.vlgmr.msra.gmra.mxu1 %vm38_vm0, %v740_v53 }
 0x20d   :  { %v1508_v56 = vpop.eup %1507  ;;  %1468 = vmatmul.mubr.msk.f32.vlgmr.msra.gmra.mxu0 %vm38_vm0, %v741_v55  ;;  %1471 = vmatpush3.msra.mxu1 %v37_v54 }
 0x20e   :  { %1472 = vmatprep.mubr.msk.f32.mxu1 %vm1510_vm1, %v1509_v0  ;;  %v742_v57 = vmul.f32 %v1508_v56, %v1646_v24 }
 0x210   :  { %1473 = vmatmul.mubr.msk.f32.vlgmr.msra.gmra.mxu1 %vm38_vm0, %v742_v57 }
 0x2c0   :  { %v812_v58 = vpop.f32.mrf.mxu0 }
 0x2c1   :  { %1327 = vst.msk [vmem:[%s1738_s3] sm:$0xff] %vm38_vm0, %v812_v58 }
 0x2c2   :  { %v1439_v59 = vpop.f32.mrf.mxu0 }
 0x2c4   :  { %v885_v60 = vpop.f32.mrf.mxu1 }
 0x2c5   :  { %1328 = vst.msk [vmem:[%s1738_s3 + $0x8] sm:$0xff] %vm38_vm0, %v885_v60  ;;  %v958_v61 = vpop.f32.mrf.mxu0 }
 0x2c6   :  { %1329 = vst.msk [vmem:[%s1738_s3 + $0x10] sm:$0xff] %vm38_vm0, %v958_v61  ;;  %v1444_v0 = vpop.f32.mrf.mxu1 }
 0x2c7   :  { %v1449_v62 = vpop.f32.mrf.mxu0 }
 0x2c8   :  { %v1031_v63 = vpop.f32.mrf.mxu1 }
 0x2c9   :  { %1330 = vst.msk [vmem:[%s1738_s3 + $0x18] sm:$0xff] %vm38_vm0, %v1031_v63  ;;  %v1104_v1 = vpop.f32.mrf.mxu0 }
 0x2ca   :  { %1331 = vst.msk [vmem:[%s1738_s3 + $0x20] sm:$0xff] %vm38_vm0, %v1104_v1  ;;  %v1454_v2 = vpop.f32.mrf.mxu1 }
 0x2cb   :  { %v1459_v3 = vpop.f32.mrf.mxu0 }
 0x2cc   :  { %v1177_v4 = vpop.f32.mrf.mxu1 }
 0x2cd   :  { %1332 = vst.msk [vmem:[%s1738_s3 + $0x28] sm:$0xff] %vm38_vm0, %v1177_v4  ;;  %v1250_v5 = vpop.f32.mrf.mxu0 }
 0x2ce   :  { %1333 = vst.msk [vmem:[%s1738_s3 + $0x30] sm:$0xff] %vm38_vm0, %v1250_v5  ;;  %v1464_v6 = vpop.f32.mrf.mxu1 }
 0x2cf   :  { %v1469_v7 = vpop.f32.mrf.mxu0 }
 0x2d0   :  { %v1323_v8 = vpop.f32.mrf.mxu1 }
 0x2d1   :  { %1334 = vst.msk [vmem:[%s1738_s3 + $0x38] sm:$0xff] %vm38_vm0, %v1323_v8 }
 0x2d2   :  { %v1474_v9 = vpop.f32.mrf.mxu1 }

// kernel: time_series_transformer_forward.29
= control target key start
LH: loop header
LB: loop body
LE: loop exit
PB: predicated region body
PF: predicated region fallthrough
CT: control target
= control target key end

     0   :  { %v2077_v3 = vmov 0.0   ;;  %vm176_vm0 = vcmask 261120   ;;  %s3267_s1 = inlined_call_operand.vmem [shape: f32[32,2048], index: 1, kind: input, shape index: {}]   ;;  %s3268_s0 = inlined_call_operand.vmem [shape: f32[16,32], index: 0, kind: input, shape index: {}]   ;;  %s3269_s3 = inlined_call_operand.vmem [shape: f32[2048,32], index: 3, kind: input, shape index: {}]   ;;  %s3270_s2 = inlined_call_operand.vmem [shape: f32[1,2048], index: 2, kind: input, shape index: {}]   ;;  %s3271_s4 = inlined_call_operand.vmem [shape: f32[1,32], index: 4, kind: input, shape index: {}]   ;;  %s3272_s5 = inlined_call_operand.vmem [shape: f32[1,32], index: 5, kind: input, shape index: {}]   ;;  %s3273_s6 = inlined_call_operand.vmem [shape: f32[1,32], index: 6, kind: input, shape index: {}]   ;;  %s3274_s7 = inlined_call_operand.vmem [shape: f32[16,32], index: 7, kind: output, shape index: {}]  }
   0x1   :  { %v77_v0 = vld [vmem:[%s3267_s1 + $0x188] sm:$0xff]  ;;  %v79_v1 = vld [vmem:[%s3267_s1 + $0x198] sm:$0xff]  ;;  %v76_v2 = vld [vmem:[%s3267_s1 + $0x180] sm:$0xff]  ;;  %247 = vmatprep.mubr.f32.mxu0 %v2077_v3  ;;  %324 = vmatprep.mubr.f32.mxu1 %v2077_v3 }
   0x2   :  { %207 = vmatprep.subr.mxu0 %v77_v0  ;;  %284 = vmatprep.subr.mxu1 %v79_v1  ;;  %v78_v4 = vld [vmem:[%s3267_s1 + $0x190] sm:$0xff]  ;;  %v61_v5 = vld [vmem:[%s3267_s1 + $0x108] sm:$0xff]  ;;  %v63_v6 = vld [vmem:[%s3267_s1 + $0x118] sm:$0xff] }
   0x3   :  { %208 = vmatpush1.msra.mxu0 %v76_v2  ;;  %285 = vmatpush1.msra.mxu1 %v78_v4  ;;  %v60_v7 = vld [vmem:[%s3267_s1 + $0x100] sm:$0xff]  ;;  %v62_v8 = vld [vmem:[%s3267_s1 + $0x110] sm:$0xff]  ;;  %v45_v9 = vld [vmem:[%s3267_s1 + $0x88] sm:$0xff] }
   0x4   :  { %209 = vmatprep.subr.mxu0 %v61_v5  ;;  %286 = vmatprep.subr.mxu1 %v63_v6  ;;  %v47_v10 = vld [vmem:[%s3267_s1 + $0x98] sm:$0xff]  ;;  %v44_v11 = vld [vmem:[%s3267_s1 + $0x80] sm:$0xff]  ;;  %v46_v12 = vld [vmem:[%s3267_s1 + $0x90] sm:$0xff] }
   0x5   :  { %210 = vmatpush1.msra.mxu0 %v60_v7  ;;  %287 = vmatpush1.msra.mxu1 %v62_v8  ;;  %v29_v13 = vld [vmem:[%s3267_s1 + $0x8] sm:$0xff]  ;;  %v31_v14 = vld [vmem:[%s3267_s1 + $0x18] sm:$0xff]  ;;  %v28_v15 = vld [vmem:[%s3267_s1] sm:$0xff] }
   0x6   :  { %211 = vmatprep.subr.mxu0 %v45_v9  ;;  %288 = vmatprep.subr.mxu1 %v47_v10  ;;  %v30_v16 = vld [vmem:[%s3267_s1 + $0x10] sm:$0xff]  ;;  %v2171_v17 = vld [vmem:[%s3268_s0] sm:$0xff]  ;;  %v81_v18 = vld [vmem:[%s3267_s1 + $0x1a8] sm:$0xff] }
   0x7   :  { %212 = vmatpush1.msra.mxu0 %v44_v11  ;;  %289 = vmatpush1.msra.mxu1 %v46_v12  ;;  %v80_v19 = vld [vmem:[%s3267_s1 + $0x1a0] sm:$0xff]  ;;  %v83_v20 = vld [vmem:[%s3267_s1 + $0x1b8] sm:$0xff]  ;;  %v65_v21 = vld [vmem:[%s3267_s1 + $0x128] sm:$0xff] }
   0x8   :  { %213 = vmatprep.subr.mxu0 %v29_v13  ;;  %290 = vmatprep.subr.mxu1 %v31_v14  ;;  %v2193_v22 = vld [vmem:[%s3268_s0 + $0x8] sm:$0xff]  ;;  %v82_v23 = vld [vmem:[%s3267_s1 + $0x1b0] sm:$0xff]  ;;  %v64_v24 = vld [vmem:[%s3267_s1 + $0x120] sm:$0xff] }
   0x9   :  { %214 = vmatpush1.msra.mxu0 %v28_v15  ;;  %291 = vmatpush1.msra.mxu1 %v30_v16  ;;  %v67_v25 = vld [vmem:[%s3267_s1 + $0x138] sm:$0xff]  ;;  %v49_v26 = vld [vmem:[%s3267_s1 + $0xa8] sm:$0xff]  ;;  %v66_v27 = vld [vmem:[%s3267_s1 + $0x130] sm:$0xff] }
   0xa   :  { %1747 = vmatmul.mubr.msk.f32.vlgmr.msra.gmra.mxu0 %vm176_vm0, %v2171_v17  ;;  %1749 = vmatmul.mubr.msk.f32.vlgmr.msra.gmra.mxu1 %vm176_vm0, %v2171_v17  ;;  %v48_v28 = vld [vmem:[%s3267_s1 + $0xa0] sm:$0xff]  ;;  %v51_v29 = vld [vmem:[%s3267_s1 + $0xb8] sm:$0xff]  ;;  %v33_v30 = vld [vmem:[%s3267_s1 + $0x28] sm:$0xff] }
   0xb   :  { %253 = vmatprep.mubr.f32.mxu0 %v2077_v3  ;;  %361 = vmatprep.subr.mxu0 %v81_v18  ;;  %v50_v31 = vld [vmem:[%s3267_s1 + $0xb0] sm:$0xff]  ;;  %v32_v32 = vld [vmem:[%s3267_s1 + $0x20] sm:$0xff]  ;;  %v35_v33 = vld [vmem:[%s3267_s1 + $0x38] sm:$0xff] }
   0xc   :  { %362 = vmatpush1.msra.mxu0 %v80_v19  ;;  %438 = vmatprep.subr.mxu1 %v83_v20  ;;  %v34_v34 = vld [vmem:[%s3267_s1 + $0x30] sm:$0xff]  ;;  %v85_v35 = vld [vmem:[%s3267_s1 + $0x1c8] sm:$0xff]  ;;  %v84_v36 = vld [vmem:[%s3267_s1 + $0x1c0] sm:$0xff] }
   0xd   :  { %330 = vmatprep.mubr.f32.mxu1 %v2077_v3  ;;  %363 = vmatprep.subr.mxu0 %v65_v21  ;;  %v87_v37 = vld [vmem:[%s3267_s1 + $0x1d8] sm:$0xff]  ;;  %v69_v38 = vld [vmem:[%s3267_s1 + $0x148] sm:$0xff]  ;;  %v86_v39 = vld [vmem:[%s3267_s1 + $0x1d0] sm:$0xff] }
   0xe   :  { %1748 = vmatmul.mubr.msk.f32.gmra.mxu0 %vm176_vm0, %v2193_v22  ;;  %439 = vmatpush1.msra.mxu1 %v82_v23  ;;  %v68_v40 = vld [vmem:[%s3267_s1 + $0x140] sm:$0xff]  ;;  %v71_v41 = vld [vmem:[%s3267_s1 + $0x158] sm:$0xff]  ;;  %v53_v42 = vld [vmem:[%s3267_s1 + $0xc8] sm:$0xff] }
   0xf   :  { %1750 = vmatmul.mubr.msk.f32.gmra.mxu1 %vm176_vm0, %v2193_v22  ;;  %364 = vmatpush1.msra.mxu0 %v64_v24  ;;  %v70_v43 = vld [vmem:[%s3267_s1 + $0x150] sm:$0xff]  ;;  %v52_v44 = vld [vmem:[%s3267_s1 + $0xc0] sm:$0xff]  ;;  %v55_v45 = vld [vmem:[%s3267_s1 + $0xd8] sm:$0xff] }
  0x10   :  { %440 = vmatprep.subr.mxu1 %v67_v25  ;;  %365 = vmatprep.subr.mxu0 %v49_v26  ;;  %v37_v46 = vld [vmem:[%s3267_s1 + $0x48] sm:$0xff]  ;;  %v54_v47 = vld [vmem:[%s3267_s1 + $0xd0] sm:$0xff]  ;;  %v36_v48 = vld [vmem:[%s3267_s1 + $0x40] sm:$0xff] }
  0x11   :  { %441 = vmatpush1.msra.mxu1 %v66_v27  ;;  %366 = vmatpush1.msra.mxu0 %v48_v28  ;;  %v39_v49 = vld [vmem:[%s3267_s1 + $0x58] sm:$0xff]  ;;  %v38_v50 = vld [vmem:[%s3267_s1 + $0x50] sm:$0xff]  ;;  %v89_v51 = vld [vmem:[%s3267_s1 + $0x1e8] sm:$0xff] }
  0x12   :  { %442 = vmatprep.subr.mxu1 %v51_v29  ;;  %367 = vmatprep.subr.mxu0 %v33_v30  ;;  %v88_v52 = vld [vmem:[%s3267_s1 + $0x1e0] sm:$0xff]  ;;  %v73_v53 = vld [vmem:[%s3267_s1 + $0x168] sm:$0xff]  ;;  %v91_v54 = vld [vmem:[%s3267_s1 + $0x1f8] sm:$0xff] }
  0x13   :  { %443 = vmatpush1.msra.mxu1 %v50_v31  ;;  %368 = vmatpush1.msra.mxu0 %v32_v32  ;;  %v72_v55 = vld [vmem:[%s3267_s1 + $0x160] sm:$0xff]  ;;  %v57_v56 = vld [vmem:[%s3267_s1 + $0xe8] sm:$0xff]  ;;  %v90_v57 = vld [vmem:[%s3267_s1 + $0x1f0] sm:$0xff] }
  0x14   :  { %401 = vmatprep.mubr.f32.mxu0 %v2077_v3  ;;  %444 = vmatprep.subr.mxu1 %v35_v33  ;;  %v56_v58 = vld [vmem:[%s3267_s1 + $0xe0] sm:$0xff]  ;;  %v75_v59 = vld [vmem:[%s3267_s1 + $0x178] sm:$0xff]  ;;  %v41_v60 = vld [vmem:[%s3267_s1 + $0x68] sm:$0xff] }
  0x15   :  { %1751 = vmatmul.mubr.msk.f32.vlgmr.msra.gmra.mxu0 %vm176_vm0, %v2171_v17  ;;  %445 = vmatpush1.msra.mxu1 %v34_v34  ;;  %v74_v61 = vld [vmem:[%s3267_s1 + $0x170] sm:$0xff]  ;;  %v40_v62 = vld [vmem:[%s3267_s1 + $0x60] sm:$0xff]  ;;  %v59_v63 = vld [vmem:[%s3267_s1 + $0xf8] sm:$0xff] }
  0x16   :  { %478 = vmatprep.mubr.f32.mxu1 %v2077_v3  ;;  %407 = vmatprep.mubr.f32.mxu0 %v2077_v3  ;;  %v58_v0 = vld [vmem:[%s3267_s1 + $0xf0] sm:$0xff]  ;;  %v43_v1 = vld [vmem:[%s3267_s1 + $0x78] sm:$0xff]  ;;  %v892_v12 = vld [vmem:[%s3269_s3 + $0x1e8] sm:$0xff] }
  0x17   :  { %1753 = vmatmul.mubr.msk.f32.vlgmr.msra.gmra.mxu1 %vm176_vm0, %v2171_v17  ;;  %515 = vmatprep.subr.mxu0 %v85_v35  ;;  %v42_v2 = vld [vmem:[%s3267_s1 + $0x70] sm:$0xff]  ;;  %v862_v4 = vld [vmem:[%s3269_s3 + $0xf8] sm:$0xff]  ;;  %v844_v13 = vld [vmem:[%s3269_s3 + $0x68] sm:$0xff] }
  0x18   :  { %484 = vmatprep.mubr.f32.mxu1 %v2077_v3  ;;  %516 = vmatpush1.msra.mxu0 %v84_v36  ;;  %v894_v5 = vld [vmem:[%s3269_s3 + $0x1f8] sm:$0xff]  ;;  %v861_v8 = vld [vmem:[%s3269_s3 + $0xf0] sm:$0xff]  ;;  %v876_v14 = vld [vmem:[%s3269_s3 + $0x168] sm:$0xff] }
  0x19   :  { %1752 = vmatmul.mubr.msk.f32.gmra.mxu0 %vm176_vm0, %v2193_v22  ;;  %592 = vmatprep.subr.mxu1 %v87_v37  ;;  %v846_v6 = vld [vmem:[%s3269_s3 + $0x78] sm:$0xff]  ;;  %v893_v9 = vld [vmem:[%s3269_s3 + $0x1f0] sm:$0xff]  ;;  %v859_v15 = vld [vmem:[%s3269_s3 + $0xe0] sm:$0xff] }
  0x1a   :  { %517 = vmatprep.subr.mxu0 %v69_v38  ;;  %593 = vmatpush1.msra.mxu1 %v86_v39  ;;  %v878_v7 = vld [vmem:[%s3269_s3 + $0x178] sm:$0xff]  ;;  %v845_v10 = vld [vmem:[%s3269_s3 + $0x70] sm:$0xff]  ;;  %v891_v16 = vld [vmem:[%s3269_s3 + $0x1e0] sm:$0xff] }
  0x1b   :  { %1754 = vmatmul.mubr.msk.f32.gmra.mxu1 %vm176_vm0, %v2193_v22  ;;  %518 = vmatpush1.msra.mxu0 %v68_v40  ;;  %v877_v11 = vld [vmem:[%s3269_s3 + $0x170] sm:$0xff]  ;;  %v875_v18 = vld [vmem:[%s3269_s3 + $0x160] sm:$0xff]  ;;  %v858_v19 = vld [vmem:[%s3269_s3 + $0xd8] sm:$0xff] }
  0x1c   :  { %594 = vmatprep.subr.mxu1 %v71_v41  ;;  %519 = vmatprep.subr.mxu0 %v53_v42  ;;  %v890_v20 = vld [vmem:[%s3269_s3 + $0x1d8] sm:$0xff]  ;;  %v857_v23 = vld [vmem:[%s3269_s3 + $0xd0] sm:$0xff]  ;;  %v856_v27 = vld [vmem:[%s3269_s3 + $0xc8] sm:$0xff] }
  0x1d   :  { %595 = vmatpush1.msra.mxu1 %v70_v43  ;;  %520 = vmatpush1.msra.mxu0 %v52_v44  ;;  %v842_v21 = vld [vmem:[%s3269_s3 + $0x58] sm:$0xff]  ;;  %v889_v24 = vld [vmem:[%s3269_s3 + $0x1d0] sm:$0xff]  ;;  %v888_v28 = vld [vmem:[%s3269_s3 + $0x1c8] sm:$0xff] }
  0x1e   :  { %596 = vmatprep.subr.mxu1 %v55_v45  ;;  %521 = vmatprep.subr.mxu0 %v37_v46  ;;  %v841_v25 = vld [vmem:[%s3269_s3 + $0x50] sm:$0xff]  ;;  %v840_v29 = vld [vmem:[%s3269_s3 + $0x48] sm:$0xff]  ;;  %v855_v31 = vld [vmem:[%s3269_s3 + $0xc0] sm:$0xff] }
  0x1f   :  { %597 = vmatpush1.msra.mxu1 %v54_v47  ;;  %522 = vmatpush1.msra.mxu0 %v36_v48  ;;  %v873_v26 = vld [vmem:[%s3269_s3 + $0x150] sm:$0xff]  ;;  %v872_v30 = vld [vmem:[%s3269_s3 + $0x148] sm:$0xff]  ;;  %v887_v32 = vld [vmem:[%s3269_s3 + $0x1c0] sm:$0xff] }
  0x20   :  { %555 = vmatprep.mubr.f32.mxu0 %v2077_v3  ;;  %598 = vmatprep.subr.mxu1 %v39_v49  ;;  %v839_v33 = vld [vmem:[%s3269_s3 + $0x40] sm:$0xff]  ;;  %v854_v35 = vld [vmem:[%s3269_s3 + $0xb8] sm:$0xff]  ;;  %v853_v39 = vld [vmem:[%s3269_s3 + $0xb0] sm:$0xff] }
  0x21   :  { %1755 = vmatmul.mubr.msk.f32.vlgmr.msra.gmra.mxu0 %vm176_vm0, %v2171_v17  ;;  %599 = vmatpush1.msra.mxu1 %v38_v50  ;;  %v871_v34 = vld [vmem:[%s3269_s3 + $0x140] sm:$0xff]  ;;  %v886_v36 = vld [vmem:[%s3269_s3 + $0x1b8] sm:$0xff]  ;;  %v885_v40 = vld [vmem:[%s3269_s3 + $0x1b0] sm:$0xff] }
  0x22   :  { %632 = vmatprep.mubr.f32.mxu1 %v2077_v3  ;;  %561 = vmatprep.mubr.f32.mxu0 %v2077_v3  ;;  %v838_v37 = vld [vmem:[%s3269_s3 + $0x38] sm:$0xff]  ;;  %v837_v41 = vld [vmem:[%s3269_s3 + $0x30] sm:$0xff]  ;;  %v852_v43 = vld [vmem:[%s3269_s3 + $0xa8] sm:$0xff] }
  0x23   :  { %1757 = vmatmul.mubr.msk.f32.vlgmr.msra.gmra.mxu1 %vm176_vm0, %v2171_v17  ;;  %669 = vmatprep.subr.mxu0 %v89_v51  ;;  %v870_v38 = vld [vmem:[%s3269_s3 + $0x138] sm:$0xff]  ;;  %v869_v42 = vld [vmem:[%s3269_s3 + $0x130] sm:$0xff]  ;;  %v884_v44 = vld [vmem:[%s3269_s3 + $0x1a8] sm:$0xff] }
  0x24   :  { %638 = vmatprep.mubr.f32.mxu1 %v2077_v3  ;;  %670 = vmatpush1.msra.mxu0 %v88_v52  ;;  %v836_v45 = vld [vmem:[%s3269_s3 + $0x28] sm:$0xff]  ;;  %v851_v47 = vld [vmem:[%s3269_s3 + $0xa0] sm:$0xff]  ;;  %v850_v51 = vld [vmem:[%s3269_s3 + $0x98] sm:$0xff] }
  0x25   :  { %1756 = vmatmul.mubr.msk.f32.gmra.mxu0 %vm176_vm0, %v2193_v22  ;;  %671 = vmatprep.subr.mxu0 %v73_v53  ;;  %v868_v46 = vld [vmem:[%s3269_s3 + $0x128] sm:$0xff]  ;;  %v883_v48 = vld [vmem:[%s3269_s3 + $0x1a0] sm:$0xff]  ;;  %v882_v52 = vld [vmem:[%s3269_s3 + $0x198] sm:$0xff] }
  0x26   :  { %746 = vmatprep.subr.mxu1 %v91_v54  ;;  %672 = vmatpush1.msra.mxu0 %v72_v55  ;;  %v835_v49 = vld [vmem:[%s3269_s3 + $0x20] sm:$0xff]  ;;  %v834_v53 = vld [vmem:[%s3269_s3 + $0x18] sm:$0xff]  ;;  %v849_v55 = vld [vmem:[%s3269_s3 + $0x90] sm:$0xff] }
  0x27   :  { %1758 = vmatmul.mubr.msk.f32.gmra.mxu1 %vm176_vm0, %v2193_v22  ;;  %673 = vmatprep.subr.mxu0 %v57_v56  ;;  %v867_v50 = vld [vmem:[%s3269_s3 + $0x120] sm:$0xff]  ;;  %v866_v54 = vld [vmem:[%s3269_s3 + $0x118] sm:$0xff]  ;;  %v881_v56 = vld [vmem:[%s3269_s3 + $0x190] sm:$0xff] }
  0x28   :  { %747 = vmatpush1.msra.mxu1 %v90_v57  ;;  %674 = vmatpush1.msra.mxu0 %v56_v58  ;;  %v833_v57 = vld [vmem:[%s3269_s3 + $0x10] sm:$0xff] }
  0x29   :  { %748 = vmatprep.subr.mxu1 %v75_v59  ;;  %675 = vmatprep.subr.mxu0 %v41_v60  ;;  %v865_v58 = vld [vmem:[%s3269_s3 + $0x110] sm:$0xff]  ;;  %v848_v59 = vld [vmem:[%s3269_s3 + $0x88] sm:$0xff] }
  0x2a   :  { %749 = vmatpush1.msra.mxu1 %v74_v61  ;;  %676 = vmatpush1.msra.mxu0 %v40_v62  ;;  %v880_v60 = vld [vmem:[%s3269_s3 + $0x188] sm:$0xff] }
  0x2b   :  { %750 = vmatprep.subr.mxu1 %v59_v63  ;;  %709 = vmatprep.mubr.f32.mxu0 %v2077_v3  ;;  %v832_v61 = vld [vmem:[%s3269_s3 + $0x8] sm:$0xff]  ;;  %v847_v63 = vld [vmem:[%s3269_s3 + $0x80] sm:$0xff] }
  0x2c   :  { %751 = vmatpush1.msra.mxu1 %v58_v0  ;;  %1759 = vmatmul.mubr.msk.f32.vlgmr.msra.gmra.mxu0 %vm176_vm0, %v2171_v17  ;;  %v864_v62 = vld [vmem:[%s3269_s3 + $0x108] sm:$0xff]  ;;  %v879_v0 = vld [vmem:[%s3269_s3 + $0x180] sm:$0xff] }
  0x2d   :  { %752 = vmatprep.subr.mxu1 %v43_v1  ;;  %786 = vmatprep.mubr.f32.mxu1 %v2077_v3  ;;  %v831_v1 = vld [vmem:[%s3269_s3] sm:$0xff] }
  0x2e   :  { %753 = vmatpush1.msra.mxu1 %v42_v2  ;;  %715 = vmatprep.mubr.f32.mxu0 %v2077_v3  ;;  %v863_v2 = vld [vmem:[%s3269_s3 + $0x100] sm:$0xff] }
  0x2f   :  { %1761 = vmatmul.mubr.msk.f32.vlgmr.msra.gmra.mxu1 %vm176_vm0, %v2171_v17  ;;  %1766 = vmatprep.subr.mxu0 %v862_v4  ;;  %v843_v17 = vld [vmem:[%s3269_s3 + $0x60] sm:$0xff]  ;;  %v926_v4 = vld [vmem:[%s3269_s3 + $0x2f8] sm:$0xff] }
  0x30   :  { %1760 = vmatmul.mubr.msk.f32.gmra.mxu0 %vm176_vm0, %v2193_v22  ;;  %792 = vmatprep.mubr.f32.mxu1 %v2077_v3  ;;  %v860_v3 = vld [vmem:[%s3269_s3 + $0xe8] sm:$0xff] }
  0x31   :  { %1804 = vmatprep.subr.mxu1 %v894_v5  ;;  %1767 = vmatpush3.msra.mxu0 %v846_v6  ;;  %v958_v5 = vld [vmem:[%s3269_s3 + $0x3f8] sm:$0xff]  ;;  %v96_v6 = vlaneseq }
  0x32   :  { %1805 = vmatpush3.msra.mxu1 %v878_v7  ;;  %1768 = vmatprep.subr.mxu0 %v861_v8 }
  0x33   :  { %1762 = vmatmul.mubr.msk.f32.gmra.mxu1 %vm176_vm0, %v2193_v22  ;;  %1806 = vmatprep.subr.mxu1 %v893_v9  ;;  %v874_v22 = vld [vmem:[%s3269_s3 + $0x158] sm:$0xff]  ;;  %v2566_v7 = vshrl.u32 %v96_v6, 7 }
  0x34   :  { %1769 = vmatpush3.msra.mxu0 %v845_v10  ;;  %1807 = vmatpush3.msra.mxu1 %v877_v11  ;;  %v2573_v10 = vld [vmem:[%s3270_s2] sm:$0xff] }
  0x35   :  { %1770 = vmatprep.subr.mxu0 %v860_v3  ;;  %1808 = vmatprep.subr.mxu1 %v892_v12  ;;  %v106_v8 = vsub.s32 2, %v2566_v7  ;;  %v98_v9 = vsub.s32 0, %v2566_v7  ;;  %v102_v11 = vsub.s32 1, %v2566_v7  ;;  %v110_v3 = vsub.s32 3, %v2566_v7 }
  0x36   :  { %1771 = vmatpush3.msra.mxu0 %v844_v13  ;;  %1809 = vmatpush3.msra.mxu1 %v876_v14 }
  0x37   :  { %1772 = vmatprep.subr.mxu0 %v859_v15  ;;  %1810 = vmatprep.subr.mxu1 %v891_v16  ;;  %v2580_v12 = vrot.slane %v2573_v10, %v106_v8  ;;  %v2585_v13 = vrot.slane %v2573_v10, %v98_v9  ;;  %v2590_v14 = vrot.slane %v2573_v10, %v102_v11 }
  0x38   :  { %1773 = vmatpush3.msra.mxu0 %v843_v17  ;;  %1811 = vmatpush3.msra.mxu1 %v875_v18  ;;  %v2595_v15 = vrot.slane %v2573_v10, %v110_v3 }
  0x39   :  { %1774 = vmatprep.subr.mxu0 %v858_v19  ;;  %1812 = vmatprep.subr.mxu1 %v890_v20 }
  0x3a   :  { %1775 = vmatpush3.msra.mxu0 %v842_v21  ;;  %1813 = vmatpush3.msra.mxu1 %v874_v22 }
  0x3b   :  { %1776 = vmatprep.subr.mxu0 %v857_v23  ;;  %1814 = vmatprep.subr.mxu1 %v889_v24 }
  0x3c   :  { %1777 = vmatpush3.msra.mxu0 %v841_v25  ;;  %1815 = vmatpush3.msra.mxu1 %v873_v26 }
  0x3d   :  { %1778 = vmatprep.subr.mxu0 %v856_v27  ;;  %1816 = vmatprep.subr.mxu1 %v888_v28  ;;  %v910_v28 = vld [vmem:[%s3269_s3 + $0x278] sm:$0xff] }
  0x3e   :  { %1779 = vmatpush3.msra.mxu0 %v840_v29  ;;  %1817 = vmatpush3.msra.mxu1 %v872_v30  ;;  %v942_v29 = vld [vmem:[%s3269_s3 + $0x378] sm:$0xff]  ;;  %v925_v30 = vld [vmem:[%s3269_s3 + $0x2f0] sm:$0xff] }
  0x3f   :  { %1780 = vmatprep.subr.mxu0 %v855_v31  ;;  %1818 = vmatprep.subr.mxu1 %v887_v32  ;;  %v957_v31 = vld [vmem:[%s3269_s3 + $0x3f0] sm:$0xff] }
  0x40   :  { %1781 = vmatpush3.msra.mxu0 %v839_v33  ;;  %1819 = vmatpush3.msra.mxu1 %v871_v34  ;;  %v909_v32 = vld [vmem:[%s3269_s3 + $0x270] sm:$0xff]  ;;  %v924_v34 = vld [vmem:[%s3269_s3 + $0x2e8] sm:$0xff] }
  0x41   :  { %1782 = vmatprep.subr.mxu0 %v854_v35  ;;  %1820 = vmatprep.subr.mxu1 %v886_v36  ;;  %v941_v33 = vld [vmem:[%s3269_s3 + $0x370] sm:$0xff]  ;;  %v956_v35 = vld [vmem:[%s3269_s3 + $0x3e8] sm:$0xff] }
  0x42   :  { %1783 = vmatpush3.msra.mxu0 %v838_v37  ;;  %1821 = vmatpush3.msra.mxu1 %v870_v38  ;;  %v908_v36 = vld [vmem:[%s3269_s3 + $0x268] sm:$0xff]  ;;  %v923_v38 = vld [vmem:[%s3269_s3 + $0x2e0] sm:$0xff] }
  0x43   :  { %1784 = vmatprep.subr.mxu0 %v853_v39  ;;  %1822 = vmatprep.subr.mxu1 %v885_v40  ;;  %v940_v37 = vld [vmem:[%s3269_s3 + $0x368] sm:$0xff]  ;;  %v955_v39 = vld [vmem:[%s3269_s3 + $0x3e0] sm:$0xff] }
  0x44   :  { %1785 = vmatpush3.msra.mxu0 %v837_v41  ;;  %1823 = vmatpush3.msra.mxu1 %v869_v42  ;;  %v907_v40 = vld [vmem:[%s3269_s3 + $0x260] sm:$0xff]  ;;  %v922_v42 = vld [vmem:[%s3269_s3 + $0x2d8] sm:$0xff] }
  0x45   :  { %1786 = vmatprep.subr.mxu0 %v852_v43  ;;  %1824 = vmatprep.subr.mxu1 %v884_v44  ;;  %v939_v41 = vld [vmem:[%s3269_s3 + $0x360] sm:$0xff]  ;;  %v954_v43 = vld [vmem:[%s3269_s3 + $0x3d8] sm:$0xff] }
  0x46   :  { %1787 = vmatpush3.msra.mxu0 %v836_v45  ;;  %1825 = vmatpush3.msra.mxu1 %v868_v46  ;;  %v906_v44 = vld [vmem:[%s3269_s3 + $0x258] sm:$0xff]  ;;  %v921_v46 = vld [vmem:[%s3269_s3 + $0x2d0] sm:$0xff] }
  0x47   :  { %1788 = vmatprep.subr.mxu0 %v851_v47  ;;  %1826 = vmatprep.subr.mxu1 %v883_v48  ;;  %v938_v45 = vld [vmem:[%s3269_s3 + $0x358] sm:$0xff]  ;;  %v953_v47 = vld [vmem:[%s3269_s3 + $0x3d0] sm:$0xff] }
  0x48   :  { %1789 = vmatpush3.msra.mxu0 %v835_v49  ;;  %1827 = vmatpush3.msra.mxu1 %v867_v50  ;;  %v905_v48 = vld [vmem:[%s3269_s3 + $0x250] sm:$0xff] }
  0x49   :  { %1790 = vmatprep.subr.mxu0 %v850_v51  ;;  %1828 = vmatprep.subr.mxu1 %v882_v52  ;;  %v937_v49 = vld [vmem:[%s3269_s3 + $0x350] sm:$0xff]  ;;  %v920_v51 = vld [vmem:[%s3269_s3 + $0x2c8] sm:$0xff] }
  0x4a   :  { %1791 = vmatpush3.msra.mxu0 %v834_v53  ;;  %1829 = vmatpush3.msra.mxu1 %v866_v54  ;;  %v952_v52 = vld [vmem:[%s3269_s3 + $0x3c8] sm:$0xff] }
  0x4b   :  { %1792 = vmatprep.subr.mxu0 %v849_v55  ;;  %1830 = vmatprep.subr.mxu1 %v881_v56  ;;  %v904_v53 = vld [vmem:[%s3269_s3 + $0x248] sm:$0xff]  ;;  %v919_v55 = vld [vmem:[%s3269_s3 + $0x2c0] sm:$0xff] }
  0x4c   :  { %1793 = vmatpush3.msra.mxu0 %v833_v57  ;;  %1831 = vmatpush3.msra.mxu1 %v865_v58  ;;  %v936_v54 = vld [vmem:[%s3269_s3 + $0x348] sm:$0xff]  ;;  %v951_v56 = vld [vmem:[%s3269_s3 + $0x3c0] sm:$0xff] }
  0x4d   :  { %1794 = vmatprep.subr.mxu0 %v848_v59  ;;  %1832 = vmatprep.subr.mxu1 %v880_v60  ;;  %v903_v58 = vld [vmem:[%s3269_s3 + $0x240] sm:$0xff] }
  0x4e   :  { %1795 = vmatpush3.msra.mxu0 %v832_v61  ;;  %1833 = vmatpush3.msra.mxu1 %v864_v62  ;;  %v935_v59 = vld [vmem:[%s3269_s3 + $0x340] sm:$0xff]  ;;  %v918_v61 = vld [vmem:[%s3269_s3 + $0x2b8] sm:$0xff] }
  0x4f   :  { %1796 = vmatprep.subr.mxu0 %v847_v63  ;;  %1834 = vmatprep.subr.mxu1 %v879_v0  ;;  %v950_v62 = vld [vmem:[%s3269_s3 + $0x3b8] sm:$0xff] }
  0x50   :  { %1797 = vmatpush3.msra.mxu0 %v831_v1  ;;  %1835 = vmatpush3.msra.mxu1 %v863_v2  ;;  %v902_v63 = vld [vmem:[%s3269_s3 + $0x238] sm:$0xff]  ;;  %v917_v2 = vld [vmem:[%s3269_s3 + $0x2b0] sm:$0xff] }
  0x51   :  { %1842 = vmatprep.subr.mxu0 %v926_v4  ;;  %1880 = vmatprep.subr.mxu1 %v958_v5  ;;  %v934_v0 = vld [vmem:[%s3269_s3 + $0x338] sm:$0xff]  ;;  %v949_v4 = vld [vmem:[%s3269_s3 + $0x3b0] sm:$0xff] }
  0xca   :  { %v249_v16 = vpop.f32.mrf.mxu0  ;;  %v326_v17 = vpop.f32.mrf.mxu1 }
  0xcb   :  { %v327_v18 = vadd.f32 %v326_v17, %v2580_v12  ;;  %v250_v19 = vadd.f32 %v249_v16, %v2585_v13  ;;  %v901_v16 = vld [vmem:[%s3269_s3 + $0x230] sm:$0xff] }
  0xcc   :  { %v251_v20 = vpop.f32.mrf.mxu0  ;;  %v328_v21 = vpop.f32.mrf.mxu1 }
  0xcd   :  { %v252_v22 = vadd.f32 %v251_v20, %v2590_v14  ;;  %v329_v23 = vadd.f32 %v328_v21, %v2595_v15  ;;  %v801_v24 = vmax.f32 %v327_v18, 0.0  ;;  %v799_v27 = vmax.f32 %v250_v19, 0.0  ;;  %v948_v19 = vld [vmem:[%s3269_s3 + $0x3a8] sm:$0xff] }
  0xce   :  { %v255_v50 = vpop.f32.mrf.mxu0  ;;  %v118_v18 = vsub.s32 5, %v2566_v7  ;;  %v900_v21 = vld [vmem:[%s3269_s3 + $0x228] sm:$0xff] }
  0xcf   :  { %v800_v25 = vmax.f32 %v252_v22, 0.0  ;;  %v802_v26 = vmax.f32 %v329_v23, 0.0  ;;  %v332_v57 = vpop.f32.mrf.mxu1  ;;  %v256_v6 = vadd.f32 %v255_v50, %v2585_v13  ;;  %v916_v13 = vld [vmem:[%s3269_s3 + $0x2a8] sm:$0xff]  ;;  %v126_v23 = vsub.s32 7, %v2566_v7  ;;  %v929_v50 = vld [vmem:[%s3269_s3 + $0x310] sm:$0xff] }
  0xd0   :  { %v257_v60 = vpop.f32.mrf.mxu0  ;;  %v932_v22 = vld [vmem:[%s3269_s3 + $0x328] sm:$0xff] }
  0xd1   :  { %1158 = vmatprep.mubr.f32.mxu0 %v800_v25  ;;  %1233 = vmatprep.mubr.f32.mxu1 %v802_v26  ;;  %v258_v1 = vadd.f32 %v257_v60, %v2590_v14  ;;  %v334_v5 = vpop.f32.mrf.mxu1  ;;  %v933_v14 = vld [vmem:[%s3269_s3 + $0x330] sm:$0xff]  ;;  %v915_v25 = vld [vmem:[%s3269_s3 + $0x2a0] sm:$0xff]  ;;  %v122_v26 = vsub.s32 6, %v2566_v7 }
  0xd2   :  { %1159 = vmatmul.mubr.f32.vlgmr.msra.gmra.mxu0 %v799_v27  ;;  %1234 = vmatmul.mubr.f32.vlgmr.msra.gmra.mxu1 %v801_v24  ;;  %v335_v20 = vadd.f32 %v334_v5, %v2595_v15  ;;  %v947_v15 = vld [vmem:[%s3269_s3 + $0x3a0] sm:$0xff] }
  0xd3   :  { %1843 = vmatpush3.msra.mxu0 %v910_v28  ;;  %1881 = vmatpush3.msra.mxu1 %v942_v29  ;;  %v816_v24 = vmax.f32 %v258_v1, 0.0  ;;  %v815_v28 = vmax.f32 %v256_v6, 0.0  ;;  %v333_v29 = vadd.f32 %v332_v57, %v2580_v12  ;;  %v927_v1 = vld [vmem:[%s3269_s3 + $0x300] sm:$0xff]  ;;  %v990_v6 = vld [vmem:[%s3269_s3 + $0x4f8] sm:$0xff] }
  0xd4   :  { %1844 = vmatprep.subr.mxu0 %v925_v30  ;;  %1882 = vmatprep.subr.mxu1 %v957_v31  ;;  %v899_v30 = vld [vmem:[%s3269_s3 + $0x220] sm:$0xff]  ;;  %v119_v31 = vrot.slane %v2573_v10, %v118_v18  ;;  %v818_v12 = vmax.f32 %v335_v20, 0.0  ;;  %v989_v20 = vld [vmem:[%s3269_s3 + $0x4f0] sm:$0xff] }
  0xd5   :  { %1845 = vmatpush3.msra.mxu0 %v909_v32  ;;  %1883 = vmatpush3.msra.mxu1 %v941_v33  ;;  %v2717_v17 = vpop.f32.mrf.mxu0  ;;  %v114_v33 = vsub.s32 4, %v2566_v7  ;;  %v1025_v7 = vld [vmem:[%s3269_s3 + $0x610] sm:$0xff] }
  0xd6   :  { %1846 = vmatprep.subr.mxu0 %v924_v34  ;;  %1884 = vmatprep.subr.mxu1 %v956_v35  ;;  %v931_v34 = vld [vmem:[%s3269_s3 + $0x320] sm:$0xff]  ;;  %v914_v35 = vld [vmem:[%s3269_s3 + $0x298] sm:$0xff] }
  0xd7   :  { %1847 = vmatpush3.msra.mxu0 %v908_v36  ;;  %1885 = vmatpush3.msra.mxu1 %v940_v37  ;;  %v480_v27 = vpop.f32.mrf.mxu1  ;;  %v405_v32 = vpop.f32.mrf.mxu0  ;;  %v946_v36 = vld [vmem:[%s3269_s3 + $0x398] sm:$0xff]  ;;  %v127_v37 = vrot.slane %v2573_v10, %v126_v23 }
  0xd8   :  { %1848 = vmatprep.subr.mxu0 %v923_v38  ;;  %1886 = vmatprep.subr.mxu1 %v955_v39  ;;  %v2764_v38 = vrot.slane %v2573_v10, %v122_v26  ;;  %v898_v39 = vld [vmem:[%s3269_s3 + $0x218] sm:$0xff] }
  0xd9   :  { %1849 = vmatpush3.msra.mxu0 %v907_v40  ;;  %1887 = vmatpush3.msra.mxu1 %v939_v41  ;;  %v482_v40 = vpop.f32.mrf.mxu1  ;;  %v817_v41 = vmax.f32 %v333_v29, 0.0  ;;  %v1020_v29 = vld [vmem:[%s3269_s3 + $0x5e8] sm:$0xff] }
  0xda   :  { %1850 = vmatprep.subr.mxu0 %v922_v42  ;;  %1888 = vmatprep.subr.mxu1 %v954_v43  ;;  %v406_v42 = vadd.f32 %v405_v32, %v119_v31  ;;  %v930_v43 = vld [vmem:[%s3269_s3 + $0x318] sm:$0xff]  ;;  %v1004_v32 = vld [vmem:[%s3269_s3 + $0x568] sm:$0xff] }
  0xdb   :  { %1851 = vmatpush3.msra.mxu0 %v906_v44  ;;  %1889 = vmatpush3.msra.mxu1 %v938_v45  ;;  %v913_v44 = vld [vmem:[%s3269_s3 + $0x290] sm:$0xff]  ;;  %v409_v45 = vpop.f32.mrf.mxu0 }
  0xdc   :  { %1852 = vmatprep.subr.mxu0 %v921_v46  ;;  %1890 = vmatprep.subr.mxu1 %v953_v47  ;;  %v115_v46 = vrot.slane %v2573_v10, %v114_v33  ;;  %v945_v47 = vld [vmem:[%s3269_s3 + $0x390] sm:$0xff]  ;;  %v912_v10 = vld [vmem:[%s3269_s3 + $0x288] sm:$0xff] }
  0xdd   :  { %1853 = vmatpush3.msra.mxu0 %v905_v48  ;;  %1891 = vmatpush3.msra.mxu1 %v937_v49  ;;  %v483_v48 = vadd.f32 %v482_v40, %v127_v37  ;;  %v897_v49 = vld [vmem:[%s3269_s3 + $0x210] sm:$0xff]  ;;  %v411_v57 = vpop.f32.mrf.mxu0  ;;  %v1002_v40 = vld [vmem:[%s3269_s3 + $0x558] sm:$0xff] }
  0xde   :  { %1854 = vmatprep.subr.mxu0 %v920_v51  ;;  %1892 = vmatprep.subr.mxu1 %v952_v52  ;;  %v481_v51 = vadd.f32 %v480_v27, %v2764_v38  ;;  %v944_v52 = vld [vmem:[%s3269_s3 + $0x388] sm:$0xff] }
  0xdf   :  { %1855 = vmatpush3.msra.mxu0 %v904_v53  ;;  %1893 = vmatpush3.msra.mxu1 %v936_v54  ;;  %v486_v53 = vpop.f32.mrf.mxu1  ;;  %v804_v54 = vmax.f32 %v406_v42, 0.0  ;;  %v806_v60 = vmax.f32 %v483_v48, 0.0  ;;  %v1017_v42 = vld [vmem:[%s3269_s3 + $0x5d0] sm:$0xff]  ;;  %v1000_v48 = vld [vmem:[%s3269_s3 + $0x548] sm:$0xff] }
  0xe0   :  { %1856 = vmatprep.subr.mxu0 %v919_v55  ;;  %1894 = vmatprep.subr.mxu1 %v951_v56  ;;  %v896_v55 = vld [vmem:[%s3269_s3 + $0x208] sm:$0xff] }
  0xe1   :  { %1857 = vmatpush3.msra.mxu0 %v903_v58  ;;  %1895 = vmatpush3.msra.mxu1 %v935_v59  ;;  %v928_v56 = vld [vmem:[%s3269_s3 + $0x308] sm:$0xff]  ;;  %v404_v58 = vadd.f32 %v2717_v17, %v115_v46  ;;  %v911_v59 = vld [vmem:[%s3269_s3 + $0x280] sm:$0xff]  ;;  %v974_v17 = vld [vmem:[%s3269_s3 + $0x478] sm:$0xff] }
  0xe2   :  { %1858 = vmatprep.subr.mxu0 %v918_v61  ;;  %1896 = vmatprep.subr.mxu1 %v950_v62  ;;  %v943_v61 = vld [vmem:[%s3269_s3 + $0x380] sm:$0xff] }
  0xe3   :  { %1859 = vmatpush3.msra.mxu0 %v902_v63  ;;  %1897 = vmatpush3.msra.mxu1 %v934_v0  ;;  %v895_v62 = vld [vmem:[%s3269_s3 + $0x200] sm:$0xff]  ;;  %v805_v63 = vmax.f32 %v481_v51, 0.0  ;;  %v412_v0 = vadd.f32 %v411_v57, %v119_v31  ;;  %v803_v5 = vmax.f32 %v404_v58, 0.0  ;;  %v981_v57 = vld [vmem:[%s3269_s3 + $0x4b0] sm:$0xff] }
  0xe4   :  { %1860 = vmatprep.subr.mxu0 %v917_v2  ;;  %1898 = vmatprep.subr.mxu1 %v949_v4  ;;  %v488_v2 = vpop.f32.mrf.mxu1  ;;  %v410_v4 = vadd.f32 %v409_v45, %v115_v46  ;;  %v984_v45 = vld [vmem:[%s3269_s3 + $0x4c8] sm:$0xff]  ;;  %v967_v51 = vld [vmem:[%s3269_s3 + $0x440] sm:$0xff]  ;;  %v1013_v58 = vld [vmem:[%s3269_s3 + $0x5b0] sm:$0xff] }
  0xe5   :  { %1861 = vmatpush3.msra.mxu0 %v901_v16  ;;  %1899 = vmatpush3.msra.mxu1 %v933_v14  ;;  %v1022_v16 = vld [vmem:[%s3269_s3 + $0x5f8] sm:$0xff]  ;;  %v489_v14 = vadd.f32 %v488_v2, %v127_v37  ;;  %v1016_v46 = vld [vmem:[%s3269_s3 + $0x5c8] sm:$0xff] }
  0xe6   :  { %1862 = vmatprep.subr.mxu0 %v916_v13  ;;  %1900 = vmatprep.subr.mxu1 %v948_v19  ;;  %v1006_v13 = vld [vmem:[%s3269_s3 + $0x578] sm:$0xff]  ;;  %v820_v19 = vmax.f32 %v412_v0, 0.0  ;;  %v634_v0 = vpop.f32.mrf.mxu1  ;;  %v996_v2 = vld [vmem:[%s3269_s3 + $0x528] sm:$0xff] }
  0xe7   :  { %1863 = vmatpush3.msra.mxu0 %v900_v21  ;;  %1901 = vmatpush3.msra.mxu1 %v932_v22  ;;  %v1021_v21 = vld [vmem:[%s3269_s3 + $0x5f0] sm:$0xff]  ;;  %v819_v22 = vmax.f32 %v410_v4, 0.0  ;;  %v822_v27 = vmax.f32 %v489_v14, 0.0  ;;  %v986_v37 = vld [vmem:[%s3269_s3 + $0x4d8] sm:$0xff]  ;;  %v963_v14 = vld [vmem:[%s3269_s3 + $0x420] sm:$0xff] }
  0xe8   :  { %1864 = vmatprep.subr.mxu0 %v915_v25  ;;  %1902 = vmatprep.subr.mxu1 %v947_v15  ;;  %v973_v25 = vld [vmem:[%s3269_s3 + $0x470] sm:$0xff] }
  0xe9   :  { %1163 = vmatprep.mubr.f32.mxu0 %v816_v24  ;;  %1865 = vmatpush3.msra.mxu0 %v899_v30  ;;  %v487_v24 = vadd.f32 %v486_v53, %v2764_v38  ;;  %v1005_v15 = vld [vmem:[%s3269_s3 + $0x570] sm:$0xff]  ;;  %v972_v30 = vld [vmem:[%s3269_s3 + $0x468] sm:$0xff]  ;;  %v1018_v38 = vld [vmem:[%s3269_s3 + $0x5d8] sm:$0xff] }
  0xea   :  { %1903 = vmatpush3.msra.mxu1 %v931_v34  ;;  %1164 = vmatmul.mubr.f32.gmra.mxu0 %v815_v28  ;;  %v988_v28 = vld [vmem:[%s3269_s3 + $0x4e8] sm:$0xff]  ;;  %v987_v34 = vld [vmem:[%s3269_s3 + $0x4e0] sm:$0xff]  ;;  %v1014_v53 = vld [vmem:[%s3269_s3 + $0x5b8] sm:$0xff] }
  0xeb   :  { %1866 = vmatprep.subr.mxu0 %v914_v35  ;;  %1904 = vmatprep.subr.mxu1 %v946_v36  ;;  %v821_v31 = vmax.f32 %v487_v24, 0.0  ;;  %v971_v35 = vld [vmem:[%s3269_s3 + $0x460] sm:$0xff] }
  0xec   :  { %1238 = vmatprep.mubr.f32.mxu1 %v818_v12  ;;  %1867 = vmatpush3.msra.mxu0 %v898_v39  ;;  %v1019_v12 = vld [vmem:[%s3269_s3 + $0x5e0] sm:$0xff]  ;;  %v970_v39 = vld [vmem:[%s3269_s3 + $0x458] sm:$0xff] }
  0xed   :  { %1905 = vmatpush3.msra.mxu1 %v930_v43  ;;  %1868 = vmatprep.subr.mxu0 %v913_v44  ;;  %v1003_v36 = vld [vmem:[%s3269_s3 + $0x560] sm:$0xff]  ;;  %v969_v43 = vld [vmem:[%s3269_s3 + $0x450] sm:$0xff] }
  0xee   :  { %1239 = vmatmul.mubr.f32.gmra.mxu1 %v817_v41  ;;  %1906 = vmatprep.subr.mxu1 %v945_v47  ;;  %v985_v41 = vld [vmem:[%s3269_s3 + $0x4d0] sm:$0xff]  ;;  %v968_v47 = vld [vmem:[%s3269_s3 + $0x448] sm:$0xff] }
  0xef   :  { %1869 = vmatpush3.msra.mxu0 %v897_v49  ;;  %1907 = vmatpush3.msra.mxu1 %v929_v50  ;;  %v1001_v44 = vld [vmem:[%s3269_s3 + $0x550] sm:$0xff]  ;;  %v983_v49 = vld [vmem:[%s3269_s3 + $0x4c0] sm:$0xff] }
  0xf0   :  { %1870 = vmatprep.subr.mxu0 %v912_v10  ;;  %1908 = vmatprep.subr.mxu1 %v944_v52  ;;  %v1015_v50 = vld [vmem:[%s3269_s3 + $0x5c0] sm:$0xff]  ;;  %v982_v52 = vld [vmem:[%s3269_s3 + $0x4b8] sm:$0xff] }
  0xf1   :  { %1871 = vmatpush3.msra.mxu0 %v896_v55  ;;  %1909 = vmatpush3.msra.mxu1 %v928_v56  ;;  %v999_v10 = vld [vmem:[%s3269_s3 + $0x540] sm:$0xff]  ;;  %v998_v55 = vld [vmem:[%s3269_s3 + $0x538] sm:$0xff]  ;;  %v2922_v56 = vpop.f32.mrf.mxu0 }
  0xf2   :  { %1872 = vmatprep.subr.mxu0 %v911_v59  ;;  %1308 = vmatprep.mubr.f32.mxu0 %v804_v54  ;;  %v966_v54 = vld [vmem:[%s3269_s3 + $0x438] sm:$0xff]  ;;  %v2933_v59 = vld [vmem:[%s3270_s2 + $0x8] sm:$0xff] }
  0xf3   :  { %1910 = vmatprep.subr.mxu1 %v943_v61  ;;  %1873 = vmatpush3.msra.mxu0 %v895_v62  ;;  %v997_v61 = vld [vmem:[%s3269_s3 + $0x530] sm:$0xff]  ;;  %v980_v62 = vld [vmem:[%s3269_s3 + $0x4a8] sm:$0xff]  ;;  %v135_v4 = vrot.slane %v2933_v59, %v102_v11  ;;  %v995_v11 = vld [vmem:[%s3269_s3 + $0x520] sm:$0xff] }
  0xf4   :  { %1911 = vmatpush3.msra.mxu1 %v927_v1  ;;  %1383 = vmatprep.mubr.f32.mxu1 %v806_v60  ;;  %v965_v60 = vld [vmem:[%s3269_s3 + $0x430] sm:$0xff]  ;;  %v964_v1 = vld [vmem:[%s3269_s3 + $0x428] sm:$0xff] }
  0xf5   :  { %1309 = vmatmul.mubr.f32.vlgmr.msra.gmra.mxu0 %v803_v5  ;;  %1384 = vmatmul.mubr.f32.vlgmr.msra.gmra.mxu1 %v805_v63  ;;  %v1012_v63 = vld [vmem:[%s3269_s3 + $0x5a8] sm:$0xff]  ;;  %v559_v5 = vpop.f32.mrf.mxu0 }
  0xf6   :  { %1918 = vmatprep.subr.mxu0 %v990_v6  ;;  %1956 = vmatprep.subr.mxu1 %v1022_v16  ;;  %v979_v6 = vld [vmem:[%s3269_s3 + $0x4a0] sm:$0xff] }
  0xf7   :  { %1919 = vmatpush3.msra.mxu0 %v974_v17  ;;  %1957 = vmatpush3.msra.mxu1 %v1006_v13  ;;  %v1011_v16 = vld [vmem:[%s3269_s3 + $0x5a0] sm:$0xff]  ;;  %v143_v17 = vrot.slane %v2933_v59, %v110_v3  ;;  %v2974_v13 = vrot.slane %v2933_v59, %v106_v8  ;;  %v962_v3 = vld [vmem:[%s3269_s3 + $0x418] sm:$0xff]  ;;  %v563_v24 = vpop.f32.mrf.mxu0 }
  0xf8   :  { %1920 = vmatprep.subr.mxu0 %v989_v20  ;;  %1958 = vmatprep.subr.mxu1 %v1021_v21  ;;  %v1010_v20 = vld [vmem:[%s3269_s3 + $0x598] sm:$0xff]  ;;  %v636_v21 = vpop.f32.mrf.mxu1 }
  0xf9   :  { %1313 = vmatprep.mubr.f32.mxu0 %v820_v19  ;;  %1921 = vmatpush3.msra.mxu0 %v973_v25  ;;  %v978_v19 = vld [vmem:[%s3269_s3 + $0x498] sm:$0xff]  ;;  %v131_v25 = vrot.slane %v2933_v59, %v98_v9  ;;  %v993_v9 = vld [vmem:[%s3269_s3 + $0x510] sm:$0xff] }
  0xfa   :  { %1959 = vmatpush3.msra.mxu1 %v1005_v15  ;;  %1314 = vmatmul.mubr.f32.gmra.mxu0 %v819_v22  ;;  %v560_v22 = vadd.f32 %v559_v5, %v135_v4  ;;  %v994_v8 = vld [vmem:[%s3269_s3 + $0x518] sm:$0xff]  ;;  %v977_v15 = vld [vmem:[%s3269_s3 + $0x490] sm:$0xff]  ;;  %v1083_v5 = vld [vmem:[%s3269_s3 + $0x7e0] sm:$0xff] }
  0xfb   :  { %1922 = vmatprep.subr.mxu0 %v988_v28  ;;  %1960 = vmatprep.subr.mxu1 %v1020_v29  ;;  %v637_v28 = vadd.f32 %v636_v21, %v143_v17  ;;  %v961_v29 = vld [vmem:[%s3269_s3 + $0x410] sm:$0xff] }
  0xfc   :  { %1388 = vmatprep.mubr.f32.mxu1 %v822_v27  ;;  %1923 = vmatpush3.msra.mxu0 %v972_v30  ;;  %v1009_v27 = vld [vmem:[%s3269_s3 + $0x590] sm:$0xff]  ;;  %v635_v30 = vadd.f32 %v634_v0, %v2974_v13  ;;  %v1036_v0 = vld [vmem:[%s3269_s3 + $0x668] sm:$0xff] }
  0xfd   :  { %1961 = vmatpush3.msra.mxu1 %v1004_v32  ;;  %1924 = vmatprep.subr.mxu0 %v987_v34  ;;  %v1008_v32 = vld [vmem:[%s3269_s3 + $0x588] sm:$0xff]  ;;  %v640_v34 = vpop.f32.mrf.mxu1  ;;  %v1033_v21 = vld [vmem:[%s3269_s3 + $0x650] sm:$0xff] }
  0xfe   :  { %1389 = vmatmul.mubr.f32.gmra.mxu1 %v821_v31  ;;  %1962 = vmatprep.subr.mxu1 %v1019_v12  ;;  %v976_v31 = vld [vmem:[%s3269_s3 + $0x488] sm:$0xff]  ;;  %v808_v12 = vmax.f32 %v560_v22, 0.0  ;;  %v1065_v22 = vld [vmem:[%s3269_s3 + $0x750] sm:$0xff] }
  0xff   :  { %1925 = vmatpush3.msra.mxu0 %v971_v35  ;;  %1963 = vmatpush3.msra.mxu1 %v1003_v36  ;;  %v960_v35 = vld [vmem:[%s3269_s3 + $0x408] sm:$0xff] }
 0x100   :  { %1926 = vmatprep.subr.mxu0 %v986_v37  ;;  %1964 = vmatprep.subr.mxu1 %v1018_v38  ;;  %v992_v36 = vld [vmem:[%s3269_s3 + $0x508] sm:$0xff]  ;;  %v565_v37 = vpop.f32.mrf.mxu0  ;;  %v558_v38 = vadd.f32 %v2922_v56, %v131_v25 }
 0x101   :  { %1927 = vmatpush3.msra.mxu0 %v970_v39  ;;  %1965 = vmatpush3.msra.mxu1 %v1002_v40  ;;  %v975_v39 = vld [vmem:[%s3269_s3 + $0x480] sm:$0xff]  ;;  %v810_v40 = vmax.f32 %v637_v28, 0.0 }
 0x102   :  { %1928 = vmatprep.subr.mxu0 %v985_v41  ;;  %1966 = vmatprep.subr.mxu1 %v1017_v42  ;;  %v1007_v41 = vld [vmem:[%s3269_s3 + $0x580] sm:$0xff]  ;;  %v3120_v28 = vpop.f32.mrf.mxu0 }
 0x103   :  { %1929 = vmatpush3.msra.mxu0 %v969_v43  ;;  %1967 = vmatpush3.msra.mxu1 %v1001_v44  ;;  %v959_v42 = vld [vmem:[%s3269_s3 + $0x400] sm:$0xff]  ;;  %v809_v43 = vmax.f32 %v635_v30, 0.0  ;;  %v566_v44 = vadd.f32 %v565_v37, %v135_v4 }
 0x104   :  { %1930 = vmatprep.subr.mxu0 %v984_v45  ;;  %1968 = vmatprep.subr.mxu1 %v1016_v46  ;;  %v991_v45 = vld [vmem:[%s3269_s3 + $0x500] sm:$0xff]  ;;  %v642_v46 = vpop.f32.mrf.mxu1  ;;  %v713_v37 = vpop.f32.mrf.mxu0 }
 0x105   :  { %1931 = vmatpush3.msra.mxu0 %v968_v47  ;;  %1969 = vmatpush3.msra.mxu1 %v1000_v48  ;;  %v564_v47 = vadd.f32 %v563_v24, %v131_v25  ;;  %v807_v48 = vmax.f32 %v558_v38, 0.0  ;;  %v1051_v4 = vld [vmem:[%s3269_s3 + $0x6e0] sm:$0xff]  ;;  %v1032_v24 = vld [vmem:[%s3269_s3 + $0x648] sm:$0xff] }
 0x106   :  { %1932 = vmatprep.subr.mxu0 %v983_v49  ;;  %1970 = vmatprep.subr.mxu1 %v1015_v50  ;;  %v1054_v49 = vld [vmem:[%s3269_s3 + $0x6f8] sm:$0xff]  ;;  %v1064_v25 = vld [vmem:[%s3269_s3 + $0x748] sm:$0xff]  ;;  %v1063_v30 = vld [vmem:[%s3269_s3 + $0x740] sm:$0xff] }
 0x107   :  { %1933 = vmatpush3.msra.mxu0 %v967_v51  ;;  %1971 = vmatpush3.msra.mxu1 %v999_v10  ;;  %v1086_v50 = vld [vmem:[%s3269_s3 + $0x7f8] sm:$0xff]  ;;  %v643_v51 = vadd.f32 %v642_v46, %v143_v17  ;;  %v823_v56 = vmax.f32 %v564_v47, 0.0  ;;  %v1043_v46 = vld [vmem:[%s3269_s3 + $0x6a0] sm:$0xff]  ;;  %v717_v47 = vpop.f32.mrf.mxu0 }
 0x108   :  { %1934 = vmatprep.subr.mxu0 %v982_v52  ;;  %1972 = vmatprep.subr.mxu1 %v1014_v53  ;;  %v1038_v10 = vld [vmem:[%s3269_s3 + $0x678] sm:$0xff]  ;;  %v824_v53 = vmax.f32 %v566_v44, 0.0  ;;  %v1028_v44 = vld [vmem:[%s3269_s3 + $0x628] sm:$0xff] }
 0x109   :  { %1935 = vmatpush3.msra.mxu0 %v966_v54  ;;  %1973 = vmatpush3.msra.mxu1 %v998_v55  ;;  %v1070_v52 = vld [vmem:[%s3269_s3 + $0x778] sm:$0xff]  ;;  %v1053_v54 = vld [vmem:[%s3269_s3 + $0x6f0] sm:$0xff] }
 0x10a   :  { %1936 = vmatprep.subr.mxu0 %v981_v57  ;;  %1974 = vmatprep.subr.mxu1 %v1013_v58  ;;  %v1085_v55 = vld [vmem:[%s3269_s3 + $0x7f0] sm:$0xff]  ;;  %v641_v57 = vadd.f32 %v640_v34, %v2974_v13  ;;  %v1034_v17 = vld [vmem:[%s3269_s3 + $0x658] sm:$0xff] }
 0x10b   :  { %1937 = vmatpush3.msra.mxu0 %v965_v60  ;;  %1975 = vmatpush3.msra.mxu1 %v997_v61  ;;  %v1037_v58 = vld [vmem:[%s3269_s3 + $0x670] sm:$0xff]  ;;  %v826_v61 = vmax.f32 %v643_v51, 0.0  ;;  %v1066_v13 = vld [vmem:[%s3269_s3 + $0x758] sm:$0xff]  ;;  %v159_v51 = vrot.slane %v2933_v59, %v126_v23 }
 0x10c   :  { %1938 = vmatprep.subr.mxu0 %v980_v62  ;;  %1976 = vmatprep.subr.mxu1 %v1012_v63  ;;  %v1069_v60 = vld [vmem:[%s3269_s3 + $0x770] sm:$0xff]  ;;  %v1052_v62 = vld [vmem:[%s3269_s3 + $0x6e8] sm:$0xff]  ;;  %v1030_v34 = vld [vmem:[%s3269_s3 + $0x638] sm:$0xff] }
 0x10d   :  { %1939 = vmatpush3.msra.mxu0 %v964_v1  ;;  %1977 = vmatpush3.msra.mxu1 %v996_v2  ;;  %v1084_v63 = vld [vmem:[%s3269_s3 + $0x7e8] sm:$0xff]  ;;  %v825_v1 = vmax.f32 %v641_v57, 0.0  ;;  %v1026_v23 = vld [vmem:[%s3269_s3 + $0x618] sm:$0xff]  ;;  %v1073_v57 = vld [vmem:[%s3269_s3 + $0x790] sm:$0xff] }
 0x10e   :  { %1940 = vmatprep.subr.mxu0 %v979_v6  ;;  %1978 = vmatprep.subr.mxu1 %v1011_v16  ;;  %v1068_v2 = vld [vmem:[%s3269_s3 + $0x768] sm:$0xff]  ;;  %v1035_v6 = vld [vmem:[%s3269_s3 + $0x660] sm:$0xff] }
 0x10f   :  { %1941 = vmatpush3.msra.mxu0 %v963_v14  ;;  %1979 = vmatpush3.msra.mxu1 %v995_v11  ;;  %v1067_v16 = vld [vmem:[%s3269_s3 + $0x760] sm:$0xff]  ;;  %v1050_v14 = vld [vmem:[%s3269_s3 + $0x6d8] sm:$0xff] }
 0x110   :  { %1942 = vmatprep.subr.mxu0 %v978_v19  ;;  %1980 = vmatprep.subr.mxu1 %v1010_v20  ;;  %v1082_v11 = vld [vmem:[%s3269_s3 + $0x7d8] sm:$0xff]  ;;  %v1049_v19 = vld [vmem:[%s3269_s3 + $0x6d0] sm:$0xff] }
 0x111   :  { %1943 = vmatpush3.msra.mxu0 %v962_v3  ;;  %1981 = vmatpush3.msra.mxu1 %v994_v8  ;;  %v1081_v20 = vld [vmem:[%s3269_s3 + $0x7d0] sm:$0xff]  ;;  %v1048_v3 = vld [vmem:[%s3269_s3 + $0x6c8] sm:$0xff] }
 0x112   :  { %1944 = vmatprep.subr.mxu0 %v977_v15  ;;  %1982 = vmatprep.subr.mxu1 %v1009_v27  ;;  %v1080_v8 = vld [vmem:[%s3269_s3 + $0x7c8] sm:$0xff]  ;;  %v1047_v15 = vld [vmem:[%s3269_s3 + $0x6c0] sm:$0xff] }
 0x113   :  { %1945 = vmatpush3.msra.mxu0 %v961_v29  ;;  %1983 = vmatpush3.msra.mxu1 %v993_v9  ;;  %v1079_v27 = vld [vmem:[%s3269_s3 + $0x7c0] sm:$0xff]  ;;  %v3122_v29 = vpop.f32.mrf.mxu1 }
 0x114   :  { %1946 = vmatprep.subr.mxu0 %v976_v31  ;;  %1984 = vmatprep.subr.mxu1 %v1008_v32  ;;  %v1031_v9 = vld [vmem:[%s3269_s3 + $0x640] sm:$0xff]  ;;  %v1046_v31 = vld [vmem:[%s3269_s3 + $0x6b8] sm:$0xff] }
 0x115   :  { %1947 = vmatpush3.msra.mxu0 %v960_v35  ;;  %1985 = vmatpush3.msra.mxu1 %v992_v36  ;;  %v1078_v32 = vld [vmem:[%s3269_s3 + $0x7b8] sm:$0xff]  ;;  %v1045_v35 = vld [vmem:[%s3269_s3 + $0x6b0] sm:$0xff]  ;;  %v790_v38 = vpop.f32.mrf.mxu1 }
 0x116   :  { %1948 = vmatprep.subr.mxu0 %v975_v39  ;;  %1458 = vmatprep.mubr.f32.mxu0 %v808_v12  ;;  %v1062_v12 = vld [vmem:[%s3269_s3 + $0x738] sm:$0xff]  ;;  %v1077_v36 = vld [vmem:[%s3269_s3 + $0x7b0] sm:$0xff] }
 0x117   :  { %1986 = vmatprep.subr.mxu1 %v1007_v41  ;;  %1949 = vmatpush3.msra.mxu0 %v959_v42  ;;  %v1029_v39 = vld [vmem:[%s3269_s3 + $0x630] sm:$0xff]  ;;  %v1044_v41 = vld [vmem:[%s3269_s3 + $0x6a8] sm:$0xff] }
 0x118   :  { %1987 = vmatpush3.msra.mxu1 %v991_v45  ;;  %1533 = vmatprep.mubr.f32.mxu1 %v810_v40  ;;  %v1061_v40 = vld [vmem:[%s3269_s3 + $0x730] sm:$0xff]  ;;  %v1076_v42 = vld [vmem:[%s3269_s3 + $0x7a8] sm:$0xff] }
 0x119   :  { %1459 = vmatmul.mubr.f32.vlgmr.msra.gmra.mxu0 %v807_v48  ;;  %1534 = vmatmul.mubr.f32.vlgmr.msra.gmra.mxu1 %v809_v43  ;;  %v151_v43 = vrot.slane %v2933_v59, %v118_v18  ;;  %v1060_v45 = vld [vmem:[%s3269_s3 + $0x728] sm:$0xff]  ;;  %v1075_v18 = vld [vmem:[%s3269_s3 + $0x7a0] sm:$0xff]  ;;  %v794_v48 = vpop.f32.mrf.mxu1 }
 0x11a   :  { %1994 = vmatprep.subr.mxu0 %v1054_v49  ;;  %2032 = vmatprep.subr.mxu1 %v1086_v50  ;;  %v1027_v49 = vld [vmem:[%s3269_s3 + $0x620] sm:$0xff] }
 0x11b   :  { %1995 = vmatpush3.msra.mxu0 %v1038_v10  ;;  %2033 = vmatpush3.msra.mxu1 %v1070_v52  ;;  %v1059_v50 = vld [vmem:[%s3269_s3 + $0x720] sm:$0xff]  ;;  %v714_v10 = vadd.f32 %v713_v37, %v151_v43  ;;  %v155_v52 = vrot.slane %v2933_v59, %v122_v26  ;;  %v147_v26 = vrot.slane %v2933_v59, %v114_v33  ;;  %v1057_v33 = vld [vmem:[%s3269_s3 + $0x710] sm:$0xff] }
 0x11c   :  { %1996 = vmatprep.subr.mxu0 %v1053_v54  ;;  %2034 = vmatprep.subr.mxu1 %v1085_v55  ;;  %v1074_v54 = vld [vmem:[%s3269_s3 + $0x798] sm:$0xff] }
 0x11d   :  { %1463 = vmatprep.mubr.f32.mxu0 %v824_v53  ;;  %1997 = vmatpush3.msra.mxu0 %v1037_v58  ;;  %v1042_v53 = vld [vmem:[%s3269_s3 + $0x698] sm:$0xff]  ;;  %v719_v58 = vpop.f32.mrf.mxu0  ;;  %v812_v59 = vmax.f32 %v714_v10, 0.0 }
 0x11e   :  { %2035 = vmatpush3.msra.mxu1 %v1069_v60  ;;  %1464 = vmatmul.mubr.f32.gmra.mxu0 %v823_v56  ;;  %v1058_v55 = vld [vmem:[%s3269_s3 + $0x718] sm:$0xff]  ;;  %v1041_v56 = vld [vmem:[%s3269_s3 + $0x690] sm:$0xff]  ;;  %v796_v60 = vpop.f32.mrf.mxu1 }
 0x11f   :  { %1998 = vmatprep.subr.mxu0 %v1052_v62  ;;  %2036 = vmatprep.subr.mxu1 %v1084_v63  ;;  %v789_v62 = vadd.f32 %v3122_v29, %v155_v52  ;;  %v1040_v63 = vld [vmem:[%s3269_s3 + $0x688] sm:$0xff] }
 0x120   :  { %1538 = vmatprep.mubr.f32.mxu1 %v826_v61  ;;  %1999 = vmatpush3.msra.mxu0 %v1036_v0  ;;  %v791_v61 = vadd.f32 %v790_v38, %v159_v51  ;;  %v1072_v0 = vld [vmem:[%s3269_s3 + $0x788] sm:$0xff] }
 0x121   :  { %2037 = vmatpush3.msra.mxu1 %v1068_v2  ;;  %2000 = vmatprep.subr.mxu0 %v1051_v4  ;;  %v1024_v2 = vld [vmem:[%s3269_s3 + $0x608] sm:$0xff]  ;;  %v797_v4 = vadd.f32 %v796_v60, %v159_v51 }
 0x122   :  { %1539 = vmatmul.mubr.f32.gmra.mxu1 %v825_v1  ;;  %2038 = vmatprep.subr.mxu1 %v1083_v5  ;;  %v720_v1 = vadd.f32 %v719_v58, %v151_v43  ;;  %v712_v5 = vadd.f32 %v3120_v28, %v147_v26 }
 0x123   :  { %2001 = vmatpush3.msra.mxu0 %v1035_v6  ;;  %2039 = vmatpush3.msra.mxu1 %v1067_v16  ;;  %v1056_v6 = vld [vmem:[%s3269_s3 + $0x708] sm:$0xff]  ;;  %v1039_v16 = vld [vmem:[%s3269_s3 + $0x680] sm:$0xff] }
 0x124   :  { %2002 = vmatprep.subr.mxu0 %v1050_v14  ;;  %2040 = vmatprep.subr.mxu1 %v1082_v11  ;;  %v814_v14 = vmax.f32 %v791_v61, 0.0  ;;  %v1071_v11 = vld [vmem:[%s3269_s3 + $0x780] sm:$0xff] }
 0x125   :  { %2003 = vmatpush3.msra.mxu0 %v1034_v17  ;;  %2041 = vmatpush3.msra.mxu1 %v1066_v13  ;;  %v1023_v17 = vld [vmem:[%s3269_s3 + $0x600] sm:$0xff]  ;;  %v813_v13 = vmax.f32 %v789_v62, 0.0 }
 0x126   :  { %2004 = vmatprep.subr.mxu0 %v1049_v19  ;;  %2042 = vmatprep.subr.mxu1 %v1081_v20  ;;  %v795_v19 = vadd.f32 %v794_v48, %v155_v52  ;;  %v1055_v20 = vld [vmem:[%s3269_s3 + $0x700] sm:$0xff] }
 0x127   :  { %2005 = vmatpush3.msra.mxu0 %v1033_v21  ;;  %2043 = vmatpush3.msra.mxu1 %v1065_v22  ;;  %v828_v21 = vmax.f32 %v720_v1, 0.0  ;;  %v830_v22 = vmax.f32 %v797_v4, 0.0 }
 0x128   :  { %2006 = vmatprep.subr.mxu0 %v1048_v3  ;;  %2044 = vmatprep.subr.mxu1 %v1080_v8  ;;  %v811_v3 = vmax.f32 %v712_v5, 0.0  ;;  %v718_v8 = vadd.f32 %v717_v47, %v147_v26 }
 0x129   :  { %2007 = vmatpush3.msra.mxu0 %v1032_v24  ;;  %2045 = vmatpush3.msra.mxu1 %v1064_v25  ;;  %v829_v24 = vmax.f32 %v795_v19, 0.0 }
 0x12a   :  { %2008 = vmatprep.subr.mxu0 %v1047_v15  ;;  %2046 = vmatprep.subr.mxu1 %v1079_v27  ;;  %v827_v25 = vmax.f32 %v718_v8, 0.0 }
 0x12b   :  { %2009 = vmatpush3.msra.mxu0 %v1031_v9  ;;  %2047 = vmatpush3.msra.mxu1 %v1063_v30 }
 0x12c   :  { %2010 = vmatprep.subr.mxu0 %v1046_v31  ;;  %2048 = vmatprep.subr.mxu1 %v1078_v32 }
 0x12d   :  { %2011 = vmatpush3.msra.mxu0 %v1030_v34  ;;  %2049 = vmatpush3.msra.mxu1 %v1062_v12 }
 0x12e   :  { %2012 = vmatprep.subr.mxu0 %v1045_v35  ;;  %2050 = vmatprep.subr.mxu1 %v1077_v36 }
 0x12f   :  { %2013 = vmatpush3.msra.mxu0 %v1029_v39  ;;  %2051 = vmatpush3.msra.mxu1 %v1061_v40 }
 0x130   :  { %2014 = vmatprep.subr.mxu0 %v1044_v41  ;;  %2052 = vmatprep.subr.mxu1 %v1076_v42  ;;  %v1763_v41 = vld [vmem:[%s3271_s4] ss:$0 sm:$0xff] }
 0x131   :  { %2015 = vmatpush3.msra.mxu0 %v1028_v44  ;;  %2053 = vmatpush3.msra.mxu1 %v1060_v45 }
 0x132   :  { %2016 = vmatprep.subr.mxu0 %v1043_v46  ;;  %2054 = vmatprep.subr.mxu1 %v1075_v18 }
 0x133   :  { %2017 = vmatpush3.msra.mxu0 %v1027_v49  ;;  %2055 = vmatpush3.msra.mxu1 %v1059_v50 }
 0x134   :  { %2018 = vmatprep.subr.mxu0 %v1042_v53  ;;  %2056 = vmatprep.subr.mxu1 %v1074_v54 }
 0x135   :  { %2019 = vmatpush3.msra.mxu0 %v1026_v23  ;;  %2057 = vmatpush3.msra.mxu1 %v1058_v55 }
 0x136   :  { %2020 = vmatprep.subr.mxu0 %v1041_v56  ;;  %2058 = vmatprep.subr.mxu1 %v1073_v57 }
 0x137   :  { %2021 = vmatpush3.msra.mxu0 %v1025_v7  ;;  %2059 = vmatpush3.msra.mxu1 %v1057_v33 }
 0x138   :  { %2022 = vmatprep.subr.mxu0 %v1040_v63  ;;  %2060 = vmatprep.subr.mxu1 %v1072_v0 }
 0x139   :  { %2023 = vmatpush3.msra.mxu0 %v1024_v2  ;;  %1608 = vmatprep.mubr.f32.mxu0 %v812_v59 }
 0x13a   :  { %2061 = vmatpush3.msra.mxu1 %v1056_v6  ;;  %2024 = vmatprep.subr.mxu0 %v1039_v16 }
 0x13b   :  { %2062 = vmatprep.subr.mxu1 %v1071_v11  ;;  %2025 = vmatpush3.msra.mxu0 %v1023_v17 }
 0x13c   :  { %2063 = vmatpush3.msra.mxu1 %v1055_v20  ;;  %1683 = vmatprep.mubr.f32.mxu1 %v814_v14 }
 0x13d   :  { %1609 = vmatmul.mubr.f32.vlgmr.msra.gmra.mxu0 %v811_v3  ;;  %1684 = vmatmul.mubr.f32.vlgmr.msra.gmra.mxu1 %v813_v13 }
 0x13e   :  { %1613 = vmatprep.mubr.f32.mxu0 %v828_v21  ;;  %1688 = vmatprep.mubr.f32.mxu1 %v830_v22 }
 0x141   :  { %1614 = vmatmul.mubr.f32.gmra.mxu0 %v827_v25  ;;  %1689 = vmatmul.mubr.f32.gmra.mxu1 %v829_v24 }
 0x192   :  { %v1798_v15 = vpop.f32.mrf.mxu0  ;;  %v1836_v28 = vpop.f32.mrf.mxu1 }
 0x194   :  { %v1799_v27 = vpop.f32.mrf.mxu0  ;;  %v1837_v9 = vpop.f32.mrf.mxu1 }
 0x195   :  { %v1800_v40 = vadd.f32 %v1799_v27, %v1798_v15  ;;  %v1838_v47 = vadd.f32 %v1837_v9, %v1836_v28  ;;  %v2075_v15 = vld [vmem:[%s3268_s0] sm:$0xff]  ;;  %v2076_v9 = vld [vmem:[%s3268_s0 + $0x8] sm:$0xff] }
 0x197   :  { %v1161_v44 = vadd.f32 %v1800_v40, %v1763_v41 }
 0x199   :  { %v1236_v49 = vadd.f32 %v1838_v47, %v1161_v44 }
 0x1aa   :  { %v1801_v29 = vpop.f32.mrf.mxu0 }
 0x1ac   :  { %v1802_v30 = vpop.f32.mrf.mxu0 }
 0x1ad   :  { %v1803_v45 = vadd.f32 %v1802_v30, %v1801_v29 }
 0x1ae   :  { %v1839_v31 = vpop.f32.mrf.mxu1 }
 0x1af   :  { %v1166_v50 = vadd.f32 %v1803_v45, %v1763_v41 }
 0x1b0   :  { %v1840_v34 = vpop.f32.mrf.mxu1 }
 0x1b1   :  { %v1841_v51 = vadd.f32 %v1840_v34, %v1839_v31 }
 0x1b3   :  { %v1241_v55 = vadd.f32 %v1841_v51, %v1166_v50  ;;  %v1765_v50 = vld [vmem:[%s3273_s6] ss:$0 sm:$0xff] }
 0x1b5   :  { %v1874_v32 = vpop.f32.mrf.mxu0  ;;  %v1912_v35 = vpop.f32.mrf.mxu1 }
 0x1b7   :  { %v1875_v12 = vpop.f32.mrf.mxu0  ;;  %v1913_v37 = vpop.f32.mrf.mxu1 }
 0x1b8   :  { %v1876_v48 = vadd.f32 %v1875_v12, %v1874_v32  ;;  %v1914_v26 = vadd.f32 %v1913_v37, %v1912_v35 }
 0x1ba   :  { %v1877_v36 = vpop.f32.mrf.mxu0  ;;  %v1311_v53 = vadd.f32 %v1876_v48, %v1236_v49  ;;  %v1764_v48 = vld [vmem:[%s3272_s5] ss:$0 sm:$0xff] }
 0x1bc   :  { %v1878_v38 = vpop.f32.mrf.mxu0  ;;  %v1386_v58 = vadd.f32 %v1914_v26, %v1311_v53 }
 0x1bd   :  { %v1879_v54 = vadd.f32 %v1878_v38, %v1877_v36 }
 0x1be   :  { %v1915_v39 = vpop.f32.mrf.mxu1 }
 0x1bf   :  { %v1316_v60 = vadd.f32 %v1879_v54, %v1241_v55 }
 0x1c0   :  { %v1916_v43 = vpop.f32.mrf.mxu1 }
 0x1c1   :  { %v1917_v61 = vadd.f32 %v1916_v43, %v1915_v39 }
 0x1c3   :  { %v1391_v0 = vadd.f32 %v1917_v61, %v1316_v60 }
 0x1d9   :  { %v1950_v42 = vpop.f32.mrf.mxu0  ;;  %v1988_v46 = vpop.f32.mrf.mxu1 }
 0x1db   :  { %v1951_v18 = vpop.f32.mrf.mxu0  ;;  %v1989_v10 = vpop.f32.mrf.mxu1 }
 0x1dc   :  { %v1952_v56 = vadd.f32 %v1951_v18, %v1950_v42  ;;  %v1990_v1 = vadd.f32 %v1989_v10, %v1988_v46 }
 0x1de   :  { %v1953_v52 = vpop.f32.mrf.mxu0  ;;  %v1461_v33 = vadd.f32 %v1952_v56, %v1386_v58 }
 0x1e0   :  { %v1954_v57 = vpop.f32.mrf.mxu0  ;;  %v1536_v5 = vadd.f32 %v1990_v1, %v1461_v33 }
 0x1e1   :  { %v1955_v59 = vadd.f32 %v1954_v57, %v1953_v52 }
 0x1e2   :  { %v1991_v23 = vpop.f32.mrf.mxu1 }
 0x1e3   :  { %v1466_v6 = vadd.f32 %v1955_v59, %v1391_v0 }
 0x1e4   :  { %v1992_v7 = vpop.f32.mrf.mxu1 }
 0x1e5   :  { %v1993_v16 = vadd.f32 %v1992_v7, %v1991_v23 }
 0x1e7   :  { %v1541_v22 = vadd.f32 %v1993_v16, %v1466_v6 }
 0x1fd   :  { %v2026_v62 = vpop.f32.mrf.mxu0  ;;  %v2064_v63 = vpop.f32.mrf.mxu1 }
 0x1ff   :  { %v2027_v2 = vpop.f32.mrf.mxu0  ;;  %v2065_v4 = vpop.f32.mrf.mxu1 }
 0x200   :  { %v2028_v14 = vadd.f32 %v2027_v2, %v2026_v62  ;;  %v2066_v19 = vadd.f32 %v2065_v4, %v2064_v63 }
 0x201   :  { %v2029_v11 = vpop.f32.mrf.mxu0  ;;  %v2067_v17 = vpop.f32.mrf.mxu1 }
 0x202   :  { %v1611_v13 = vadd.f32 %v2028_v14, %v1536_v5 }
 0x203   :  { %v2030_v20 = vpop.f32.mrf.mxu0  ;;  %v2068_v21 = vpop.f32.mrf.mxu1 }
 0x204   :  { %v1686_v3 = vadd.f32 %v2066_v19, %v1611_v13  ;;  %v2031_v8 = vadd.f32 %v2030_v20, %v2029_v11  ;;  %v2069_v25 = vadd.f32 %v2068_v21, %v2067_v17 }
 0x206   :  { %v1616_v24 = vadd.f32 %v2031_v8, %v1541_v22  ;;  %v1694_v27 = vadd.f32 %v2075_v15, %v1686_v3 }
 0x208   :  { %v1691_v28 = vadd.f32 %v2069_v25, %v1616_v24  ;;  %v1698_v29 = vsel %vm176_vm0, %v1694_v27, 0.0 }
 0x209   :  { %1699 = vadd.xlane.f32.xlu0 %v1698_v29 }
 0x20a   :  { %v1695_v30 = vadd.f32 %v2076_v9, %v1691_v28 }
 0x20c   :  { %v1701_v31 = vsel %vm176_vm0, %v1695_v30, 0.0 }
 0x20d   :  { %1702 = vadd.xlane.f32.xlu0 %v1701_v31 }
 0x292   :  { %v1700_v32 = vpop.xlane.xlu0 %1699 }
 0x293   :  { %v1705_v34 = vmul.f32 0.03125, %v1700_v32 }
 0x295   :  { %v1707_v12 = vsub.f32 %v1694_v27, %v1705_v34 }
 0x296   :  { %v1703_v35 = vpop.xlane.xlu0 %1702 }
 0x297   :  { %v1706_v36 = vmul.f32 0.03125, %v1703_v35  ;;  %v1709_v37 = vmul.f32 %v1707_v12, %v1707_v12 }
 0x299   :  { %v1708_v38 = vsub.f32 %v1695_v30, %v1706_v36  ;;  %v1711_v39 = vsel %vm176_vm0, %v1709_v37, 0.0 }
 0x29a   :  { %1712 = vadd.xlane.f32.xlu1 %v1711_v39 }
 0x29b   :  { %v1710_v40 = vmul.f32 %v1708_v38, %v1708_v38 }
 0x29d   :  { %v1714_v41 = vsel %vm176_vm0, %v1710_v40, 0.0 }
 0x29e   :  { %1715 = vadd.xlane.f32.xlu1 %v1714_v41 }
 0x323   :  { %v1713_v42 = vpop.xlane.xlu1 %1712 }
 0x324   :  { %v1717_v43 = vmul.f32 0.03125, %v1713_v42 }
 0x326   :  { %v1719_v44 = vadd.f32 1e-05, %v1717_v43 }
 0x327   :  { %v1716_v45 = vpop.xlane.xlu1 %1715 }
 0x328   :  { %2071 = vrsqrt.f32 %v1719_v44  ;;  %v1718_v46 = vmul.f32 0.03125, %v1716_v45 }
 0x32a   :  { %v1720_v18 = vadd.f32 1e-05, %v1718_v46 }
 0x32c   :  { %2073 = vrsqrt.f32 %v1720_v18 }
 0x335   :  { %v2072_v47 = vpop.eup %2071 }
 0x336   :  { %v1723_v49 = vmul.f32 %v2072_v47, %v1707_v12 }
 0x338   :  { %v1731_v51 = vmul.f32 %v1764_v48, %v1723_v49 }
 0x339   :  { %v2074_v10 = vpop.eup %2073 }
 0x33a   :  { %v1739_v52 = vadd.f32 %v1765_v50, %v1731_v51  ;;  %v1724_v53 = vmul.f32 %v2074_v10, %v1708_v38 }
 0x33c   :  { %1741 = vst.msk [vmem:[%s3274_s7] sm:$0xff] %vm176_vm0, %v1739_v52  ;;  %v1732_v54 = vmul.f32 %v1764_v48, %v1724_v53 }
 0x33e   :  { %v1740_v23 = vadd.f32 %v1765_v50, %v1732_v54 }
 0x340   :  { %1742 = vst.msk [vmem:[%s3274_s7 + $0x8] sm:$0xff] %vm176_vm0, %v1740_v23 }

// kernel: time_series_transformer_forward.34
= control target key start
LH: loop header
LB: loop body
LE: loop exit
PB: predicated region body
PF: predicated region fallthrough
CT: control target
= control target key end

     0   :  { %vm18_vm0 = vcmask 261120   ;;  %s118_s0 = inlined_call_operand.vmem [shape: f32[16,32], index: 0, kind: input, shape index: {}]   ;;  %s119_s1 = inlined_call_operand.vmem [shape: f32[1,32], index: 1, kind: input, shape index: {}]   ;;  %s120_s2 = inlined_call_operand.vmem [shape: f32[1,32], index: 2, kind: input, shape index: {}]   ;;  %s121_s3 = inlined_call_operand.vmem [shape: f32[16,32], index: 3, kind: output, shape index: {}]  }
   0x1   :  { %v14_v0 = vld [vmem:[%s118_s0] sm:$0xff]  ;;  %v15_v1 = vld [vmem:[%s118_s0 + $0x8] sm:$0xff] }
   0x2   :  { %v19_v2 = vsel %vm18_vm0, %v14_v0, 0.0  ;;  %v22_v3 = vsel %vm18_vm0, %v15_v1, 0.0  ;;  %v68_v21 = vld [vmem:[%s119_s1] ss:$0 sm:$0xff] }
   0x3   :  { %20 = vadd.xlane.f32.xlu0 %v19_v2  ;;  %v69_v23 = vld [vmem:[%s120_s2] ss:$0 sm:$0xff] }
   0x7   :  { %23 = vadd.xlane.f32.xlu0 %v22_v3 }
  0x8c   :  { %v21_v4 = vpop.xlane.xlu0 %20 }
  0x8d   :  { %v26_v5 = vmul.f32 0.03125, %v21_v4 }
  0x8f   :  { %v28_v6 = vsub.f32 %v14_v0, %v26_v5 }
  0x90   :  { %v24_v7 = vpop.xlane.xlu0 %23 }
  0x91   :  { %v27_v8 = vmul.f32 0.03125, %v24_v7  ;;  %v30_v9 = vmul.f32 %v28_v6, %v28_v6 }
  0x93   :  { %v29_v10 = vsub.f32 %v15_v1, %v27_v8  ;;  %v32_v11 = vsel %vm18_vm0, %v30_v9, 0.0 }
  0x94   :  { %33 = vadd.xlane.f32.xlu1 %v32_v11 }
  0x95   :  { %v31_v12 = vmul.f32 %v29_v10, %v29_v10 }
  0x97   :  { %v35_v13 = vsel %vm18_vm0, %v31_v12, 0.0 }
  0x98   :  { %36 = vadd.xlane.f32.xlu1 %v35_v13 }
 0x11d   :  { %v34_v14 = vpop.xlane.xlu1 %33 }
 0x11e   :  { %v38_v15 = vmul.f32 0.03125, %v34_v14 }
 0x120   :  { %v40_v16 = vadd.f32 1e-05, %v38_v15 }
 0x121   :  { %v37_v17 = vpop.xlane.xlu1 %36 }
 0x122   :  { %70 = vrsqrt.f32 %v40_v16  ;;  %v39_v18 = vmul.f32 0.03125, %v37_v17 }
 0x124   :  { %v41_v19 = vadd.f32 1e-05, %v39_v18 }
 0x126   :  { %72 = vrsqrt.f32 %v41_v19 }
 0x12f   :  { %v71_v20 = vpop.eup %70 }
 0x130   :  { %v44_v22 = vmul.f32 %v71_v20, %v28_v6 }
 0x132   :  { %v52_v24 = vmul.f32 %v68_v21, %v44_v22 }
 0x133   :  { %v73_v25 = vpop.eup %72 }
 0x134   :  { %v60_v26 = vadd.f32 %v69_v23, %v52_v24  ;;  %v45_v27 = vmul.f32 %v73_v25, %v29_v10 }
 0x136   :  { %62 = vst.msk [vmem:[%s121_s3] sm:$0xff] %vm18_vm0, %v60_v26  ;;  %v53_v28 = vmul.f32 %v68_v21, %v45_v27 }
 0x138   :  { %v61_v29 = vadd.f32 %v69_v23, %v53_v28 }
 0x13a   :  { %63 = vst.msk [vmem:[%s121_s3 + $0x8] sm:$0xff] %vm18_vm0, %v61_v29 }

// kernel: time_series_transformer_forward.49
= control target key start
LH: loop header
LB: loop body
LE: loop exit
PB: predicated region body
PF: predicated region fallthrough
CT: control target
= control target key end

     0   :  { %vm26_vm0 = vcmask 261120   ;;  %vm162_vm1 = vcmask 7168   ;;  %s264_s0 = inlined_call_operand.vmem [shape: f32[16,32], index: 0, kind: input, shape index: {}]   ;;  %s265_s3 = inlined_call_operand.vmem [shape: f32[32,1], index: 3, kind: input, shape index: {}]   ;;  %s266_s4 = inlined_call_operand.<no memory space> [shape: f32[1,1], index: 4, kind: input, shape index: {}]   ;;  %s267_s1 = inlined_call_operand.vmem [shape: f32[1,32], index: 1, kind: input, shape index: {}]   ;;  %s268_s2 = inlined_call_operand.vmem [shape: f32[1,32], index: 2, kind: input, shape index: {}]   ;;  %s269_s5 = inlined_call_operand.vmem [shape: f32[16,1], index: 5, kind: output, shape index: {}]  }
   0x1   :  { %v22_v0 = vld [vmem:[%s264_s0] sm:$0xff]  ;;  %v23_v1 = vld [vmem:[%s264_s0 + $0x8] sm:$0xff]  ;;  %v73_v14 = vld [vmem:[%s265_s3 + $0x18] sm:$0xff]  ;;  %v10_v18 = vstv %s266_s4 }
   0x2   :  { %v27_v2 = vsel %vm26_vm0, %v22_v0, 0.0  ;;  %v30_v3 = vsel %vm26_vm0, %v23_v1, 0.0  ;;  %v72_v15 = vld [vmem:[%s265_s3 + $0x10] sm:$0xff]  ;;  %180 = vmatprep.subr.mxu0 %v73_v14  ;;  %v71_v16 = vld [vmem:[%s265_s3 + $0x8] sm:$0xff]  ;;  %v70_v17 = vld [vmem:[%s265_s3] sm:$0xff] }
   0x3   :  { %28 = vadd.xlane.f32.xlu0 %v27_v2  ;;  %181 = vmatpush3.msra.mxu0 %v73_v14  ;;  %11 = vst [vmem:[#allocation2] sm:$0x1] %v10_v18  ;;  %v169_v26 = vld [vmem:[%s267_s1] ss:$0 sm:$0xff] }
   0x4   :  { %182 = vmatprep.subr.mxu0 %v72_v15  ;;  %v170_v28 = vld [vmem:[%s268_s2] ss:$0 sm:$0xff] }
   0x5   :  { %183 = vmatpush3.msra.mxu0 %v72_v15 }
   0x6   :  { %184 = vmatprep.subr.mxu0 %v71_v16 }
   0x7   :  { %31 = vadd.xlane.f32.xlu0 %v30_v3  ;;  %185 = vmatpush3.msra.mxu0 %v71_v16 }
   0x8   :  { %186 = vmatprep.subr.mxu0 %v70_v17 }
   0x9   :  { %187 = vmatpush3.msra.mxu0 %v70_v17 }
   0xa   :  { %v171_v35 = vld [vmem:[#allocation2] ss:$0 sm:$0xff] }
  0x8c   :  { %v29_v4 = vpop.xlane.xlu0 %28 }
  0x8d   :  { %v34_v5 = vmul.f32 0.03125, %v29_v4 }
  0x8f   :  { %v36_v6 = vsub.f32 %v22_v0, %v34_v5 }
  0x90   :  { %v32_v7 = vpop.xlane.xlu0 %31 }
  0x91   :  { %v35_v8 = vmul.f32 0.03125, %v32_v7  ;;  %v38_v9 = vmul.f32 %v36_v6, %v36_v6 }
  0x93   :  { %v37_v10 = vsub.f32 %v23_v1, %v35_v8  ;;  %v40_v11 = vsel %vm26_vm0, %v38_v9, 0.0 }
  0x94   :  { %41 = vadd.xlane.f32.xlu1 %v40_v11 }
  0x95   :  { %v39_v12 = vmul.f32 %v37_v10, %v37_v10 }
  0x97   :  { %v43_v13 = vsel %vm26_vm0, %v39_v12, 0.0 }
  0x98   :  { %44 = vadd.xlane.f32.xlu1 %v43_v13 }
 0x11d   :  { %v42_v19 = vpop.xlane.xlu1 %41 }
 0x11e   :  { %v46_v20 = vmul.f32 0.03125, %v42_v19 }
 0x120   :  { %v48_v21 = vadd.f32 1e-05, %v46_v20 }
 0x121   :  { %v45_v22 = vpop.xlane.xlu1 %44 }
 0x122   :  { %191 = vrsqrt.f32 %v48_v21  ;;  %v47_v23 = vmul.f32 0.03125, %v45_v22 }
 0x124   :  { %v49_v24 = vadd.f32 1e-05, %v47_v23 }
 0x126   :  { %193 = vrsqrt.f32 %v49_v24 }
 0x12f   :  { %v192_v25 = vpop.eup %191 }
 0x130   :  { %v52_v27 = vmul.f32 %v192_v25, %v36_v6 }
 0x132   :  { %v60_v29 = vmul.f32 %v169_v26, %v52_v27 }
 0x133   :  { %v194_v30 = vpop.eup %193 }
 0x134   :  { %v53_v31 = vmul.f32 %v194_v30, %v37_v10  ;;  %v68_v32 = vadd.f32 %v170_v28, %v60_v29 }
 0x136   :  { %v61_v33 = vmul.f32 %v169_v26, %v53_v31  ;;  %188 = vmatprep.mubr.msk.f32.mxu0 %vm26_vm0, %v68_v32 }
 0x138   :  { %v69_v34 = vadd.f32 %v170_v28, %v61_v33 }
 0x13a   :  { %189 = vmatmul.mubr.msk.f32.vlgmr.msra.gmra.mxu0 %vm26_vm0, %v69_v34 }
 0x1fa   :  { %v190_v36 = vpop.f32.mrf.mxu0 }
 0x1fb   :  { %v159_v37 = vadd.f32 %v190_v36, %v171_v35 }
 0x1fc   :  { %v153_v38 = vpop.f32.mrf.mxu0 }
 0x1fd   :  { %164 = vst.msk [vmem:[%s269_s5 + $0x8] sm:$0xff] %vm162_vm1, %v159_v37  ;;  %v154_v39 = vadd.f32 %v171_v35, %v153_v38 }
 0x1ff   :  { %163 = vst.msk [vmem:[%s269_s5] sm:$0xff] %vm162_vm1, %v154_v39 }

</bundles_post_ra>
